<compile_context>
chip_gen: v7x
topology: tpu7x:2x2x1
jax: 0.10.0
libtpu: 0.0.40
codegen_flags: <defaults>
</compile_context>

<pallas_src>
import functools

import jax
import jax.numpy as jnp
from jax.experimental import pallas as pl
from jax.experimental.pallas import tpu as pltpu


_LEAKY_SLOPE = 0.01  # PyTorch nn.LeakyReLU default negative_slope


def _leaky_relu(x):
    return jnp.where(x >= 0, x, _LEAKY_SLOPE * x)


# --------------------------------------------------------------------------------------
# Fused kernel: all n_transformers coupling blocks in one body, activation resident.
# --------------------------------------------------------------------------------------
def _fused_transformer_kernel(n_layers, half,
                              x_ref, loc_ref, logs_ref,
                              w1_ref, b1_ref, w2_ref, b2_ref,
                              w3s_ref, b3s_ref, w3t_ref, b3t_ref,
                              y_ref, ld_ref, inter_ref):
    h = x_ref[...].astype(jnp.float32)                       # (B, ls) activation, stays on-chip
    ld = jnp.zeros((h.shape[0], 1), jnp.float32)             # coupling log-det accumulator

    for i in range(n_layers):                                 # static unroll (4 layers)
        # --- ActNorm ---
        a = (h - loc_ref[i]) * jnp.exp(logs_ref[i])

        # --- alternating half swap: one lane rotation (odd layers only) ---
        if i % 2:
            a = pltpu.roll(a, half, axis=1)                   # [xb|xa] -> [xa|xb]

        # --- conditioner FCC(ls//2): 3 matmuls on the MXU ---
        # w1 is zero-padded to (ls, H) at trace time, so the full-width activation
        # feeds the MLP directly (no lane slicing of `a`).
        z1 = _leaky_relu(jnp.dot(a, w1_ref[i],
                                 preferred_element_type=jnp.float32) + b1_ref[i])
        z2 = _leaky_relu(jnp.dot(z1, w2_ref[i],
                                 preferred_element_type=jnp.float32) + b2_ref[i])

        # Lane-aligned heads (prepared at trace time):
        #   s_full = [0 | s]   -> exp(tanh(s_full)) = [1 | exp(tanh(s))]
        #   t_full = [0 | t]
        s_full = jnp.dot(z2, w3s_ref[i],
                         preferred_element_type=jnp.float32) + b3s_ref[i]
        t_full = jnp.dot(z2, w3t_ref[i],
                         preferred_element_type=jnp.float32) + b3t_ref[i]

        ts = jnp.tanh(s_full)                                 # low half is exactly 0
        h = a * jnp.exp(ts) + t_full                          # == [xa | xb*exp(s)+t], one full-width value
        ld = ld + jnp.sum(ts, axis=1, keepdims=True)          # == sum(s) (low half contributes 0)

        inter_ref[i] = h.astype(inter_ref.dtype)              # one full-row store per layer

    y_ref[...] = h.astype(y_ref.dtype)
    ld_ref[...] = ld.astype(ld_ref.dtype)


# --------------------------------------------------------------------------------------
# Trace-time parameter packing: stack layers, pad/permute weights so the kernel needs
# no in-kernel lane slicing, and hoist the batch-independent ActNorm log-det term.
# --------------------------------------------------------------------------------------
def _pack_params(layer_params):
    L = len(layer_params)
    d, H = layer_params[0]["w1"].shape

    loc = jnp.stack([p["loc"] for p in layer_params])          # (L, 1, 2d)
    logs = jnp.stack([p["log_scale"] for p in layer_params])   # (L, 1, 2d)

    w1 = jnp.stack([p["w1"] for p in layer_params])            # (L, d, H)
    w1p = jnp.concatenate([w1, jnp.zeros((L, d, H), w1.dtype)], axis=1)   # (L, 2d, H)
    b1 = jnp.stack([p["b1"] for p in layer_params])             # (L, 1, H)
    w2 = jnp.stack([p["w2"] for p in layer_params])              # (L, H, H)
    b2 = jnp.stack([p["b2"] for p in layer_params])              # (L, 1, H)

    # Split the (H, 2d) head [s | t] into two lane-aligned heads writing the HIGH half:
    #   s_full = z2 @ w3s + b3s = [0 | s],    t_full = z2 @ w3t + b3t = [0 | t]
    w3 = jnp.stack([p["w3"] for p in layer_params])              # (L, H, 2d)
    b3 = jnp.stack([p["b3"] for p in layer_params])              # (L, 1, 2d)
    zc = jnp.zeros((L, H, d), w3.dtype)
    zb = jnp.zeros((L, 1, d), b3.dtype)
    w3s = jnp.concatenate([zc, w3[:, :, :d]], axis=2)            # (L, H, 2d)
    b3s = jnp.concatenate([zb, b3[:, :, :d]], axis=2)            # (L, 1, 2d)
    w3t = jnp.concatenate([zc, w3[:, :, d:]], axis=2)            # (L, H, 2d)
    b3t = jnp.concatenate([zb, b3[:, :, d:]], axis=2)            # (L, 1, 2d)

    actnorm_ld = jnp.sum(logs)   # batch-independent; added once outside the kernel
    packed = (loc, logs, w1p, b1, w2, b2, w3s, b3s, w3t, b3t)
    return packed, actnorm_ld, d


def _const_block_spec(arr):
    nd = arr.ndim
    return pl.BlockSpec(arr.shape, lambda i, nd=nd: (0,) * nd)


# --------------------------------------------------------------------------------------
# Wrapper: mirrors TransformerModel.forward(value, is_forward=True) (unconditional).
# --------------------------------------------------------------------------------------
def transformer_model_forward(value, layer_params, *, batch_block=None):
    B, ls = value.shape
    L = len(layer_params)
    packed, actnorm_ld, d = _pack_params(layer_params)
    kernel = functools.partial(_fused_transformer_kernel, L, d)

    out_shape = (jax.ShapeDtypeStruct((B, ls), value.dtype),        # value
                 jax.ShapeDtypeStruct((B, 1), jnp.float32),         # coupling log_det
                 jax.ShapeDtypeStruct((L, B, ls), value.dtype))     # stacked intermediates

    vmem = pl.BlockSpec(memory_space=pltpu.MemorySpace.VMEM)

    if batch_block is None or batch_block >= B:
        # Whole problem is VMEM-resident; no grid, no pipelining machinery.
        y, ld, inter = pl.pallas_call(
            kernel,
            out_shape=out_shape,
            in_specs=[vmem] * (1 + len(packed)),
            out_specs=(vmem, vmem, vmem),
        )(value, *packed)
    else:
        # Batch-tiled path for large batches: grid over batch, weights whole-block
        # resident, "parallel" so v7x can shard tiles across its two TensorCores.
        assert B % batch_block == 0 and batch_block % 8 == 0, (B, batch_block)
        grid = (B // batch_block,)
        y, ld, inter = pl.pallas_call(
            kernel,
            grid=grid,
            out_shape=out_shape,
            in_specs=[pl.BlockSpec((batch_block, ls), lambda i: (i, 0))]
                     + [_const_block_spec(p) for p in packed],
            out_specs=(pl.BlockSpec((batch_block, ls), lambda i: (i, 0)),
                       pl.BlockSpec((batch_block, 1), lambda i: (i, 0)),
                       pl.BlockSpec((L, batch_block, ls), lambda i: (0, i, 0))),
            compiler_params=pltpu.CompilerParams(
                dimension_semantics=("parallel",)),
        )(value, *packed)

    log_det = ld + actnorm_ld
    return y, log_det, inter


# --------------------------------------------------------------------------------------
# Plain-JAX reference (same forward semantics, slice-based) for correctness checking.
# --------------------------------------------------------------------------------------
def _reference_forward(value, layer_params):
    hi = jax.lax.Precision.HIGHEST
    x = value.astype(jnp.float32)
    log_det = jnp.zeros((x.shape[0], 1), jnp.float32)
    inters = []
    for i, p in enumerate(layer_params):
        d = p["w1"].shape[0]
        h = (x - p["loc"]) * jnp.exp(p["log_scale"])
        if i % 2:
            xa, xb = h[:, d:], h[:, :d]
        else:
            xa, xb = h[:, :d], h[:, d:]
        z1 = _leaky_relu(jnp.dot(xa, p["w1"], precision=hi) + p["b1"])
        z2 = _leaky_relu(jnp.dot(z1, p["w2"], precision=hi) + p["b2"])
        st = jnp.dot(z2, p["w3"], precision=hi) + p["b3"]
        s = jnp.tanh(st[:, :d])
        t = st[:, d:]
        x = jnp.concatenate([xa, xb * jnp.exp(s) + t], axis=1)
        inters.append(x)
        log_det = log_det + jnp.sum(p["log_scale"]) + jnp.sum(s, axis=1, keepdims=True)
    return x, log_det, jnp.stack(inters)


# --------------------------------------------------------------------------------------
# Deterministic synthetic parameters (module shapes from __init__).
# --------------------------------------------------------------------------------------
def init_params(key, n_transformers, latent_size, hidden):
    d = latent_size // 2
    layers = []
    for i in range(n_transformers):
        keys = jax.random.split(jax.random.fold_in(key, i), 8)

        def w(k, shape, scale):
            return scale * jax.random.normal(k, shape, dtype=jnp.float32)

        layers.append(dict(
            loc=w(keys[0], (1, latent_size), 0.1),
            log_scale=w(keys[1], (1, latent_size), 0.05),
            w1=w(keys[2], (d, hidden), 0.3),
            b1=w(keys[3], (1, hidden), 0.1),
            w2=w(keys[4], (hidden, hidden), 0.2),
            b2=w(keys[5], (1, hidden), 0.1),
            w3=w(keys[6], (hidden, 2 * d), 0.1),
            b3=w(keys[7], (1, 2 * d), 0.1),
        ))
    return layers


if __name__ == "__main__":
    # config: behavior_size=16, behavior/num_layers=2  -> latent_size = 32
    n_transformers = 4
    latent_size = 32
    hidden = 64
    batch = 8

    params = init_params(jax.random.PRNGKey(0), n_transformers, latent_size, hidden)
    value = jax.random.normal(jax.random.PRNGKey(1), (batch, latent_size), dtype=jnp.float32)

    fwd = jax.jit(transformer_model_forward, static_argnames=("batch_block",))

    # --- small-batch fused path (no grid, everything VMEM-resident) ---
    y, log_det, inter = fwd(value, params)
    jax.block_until_ready(y)
    jax.block_until_ready(log_det)
    jax.block_until_ready(inter)

    assert y.shape == (batch, latent_size)
    assert log_det.shape == (batch, 1)
    assert inter.shape == (n_transformers, batch, latent_size)

    # --- numerical check against the plain-JAX reference ---
    y_r, ld_r, inter_r = _reference_forward(value, params)
    assert jnp.allclose(y, y_r, rtol=1e-3, atol=1e-3), float(jnp.max(jnp.abs(y - y_r)))
    assert jnp.allclose(log_det, ld_r, rtol=1e-3, atol=1e-3)
    assert jnp.allclose(inter, inter_r, rtol=1e-3, atol=1e-3)

    # --- batch-tiled / megacore-parallel path (larger batch) ---
    big_batch = 256
    big_value = jax.random.normal(jax.random.PRNGKey(2), (big_batch, latent_size),
                                  dtype=jnp.float32)
    yb0, ldb0, _ = fwd(big_value, params)                       # untiled
    yb1, ldb1, _ = fwd(big_value, params, batch_block=128)      # grid over batch, parallel
    jax.block_until_ready(yb1)
    assert jnp.allclose(yb0, yb1, rtol=1e-5, atol=1e-5)
    assert jnp.allclose(ldb0, ldb1, rtol=1e-5, atol=1e-5)

    print("KERNEL_OK")
</pallas_src>

<mosaic_0001>
module attributes {stable_mosaic.version = 11 : i64} {
  func.func @_fused_transformer_kernel(%arg0: memref<8x32xf32, #tpu.memory_space<vmem>>, %arg1: memref<4x1x32xf32, #tpu.memory_space<vmem>>, %arg2: memref<4x1x32xf32, #tpu.memory_space<vmem>>, %arg3: memref<4x32x64xf32, #tpu.memory_space<vmem>>, %arg4: memref<4x1x64xf32, #tpu.memory_space<vmem>>, %arg5: memref<4x64x64xf32, #tpu.memory_space<vmem>>, %arg6: memref<4x1x64xf32, #tpu.memory_space<vmem>>, %arg7: memref<4x64x32xf32, #tpu.memory_space<vmem>>, %arg8: memref<4x1x32xf32, #tpu.memory_space<vmem>>, %arg9: memref<4x64x32xf32, #tpu.memory_space<vmem>>, %arg10: memref<4x1x32xf32, #tpu.memory_space<vmem>>, %arg11: memref<8x32xf32, #tpu.memory_space<vmem>>, %arg12: memref<8x1xf32, #tpu.memory_space<vmem>>, %arg13: memref<4x8x32xf32, #tpu.memory_space<vmem>>) attributes {dimension_semantics = [], scalar_prefetch = 0 : i64, scratch_operands = 0 : i64, tpu.core_type = #tpu.core_type<tc>} {
    %c0 = arith.constant 0 : index
    %c0_0 = arith.constant 0 : index
    %0 = vector.load %arg0[%c0, %c0_0] : memref<8x32xf32, #tpu.memory_space<vmem>>, vector<8x32xf32>
    %cst = arith.constant 0.000000e+00 : f32
    %1 = vector.broadcast %cst : f32 to vector<8x1xf32>
    %c0_1 = arith.constant 0 : index
    %c0_2 = arith.constant 0 : index
    %c0_3 = arith.constant 0 : index
    %2 = vector.load %arg1[%c0_1, %c0_2, %c0_3] : memref<4x1x32xf32, #tpu.memory_space<vmem>>, vector<1x1x32xf32>
    %3 = vector.shape_cast %2 : vector<1x1x32xf32> to vector<1x32xf32>
    %4 = vector.broadcast %3 : vector<1x32xf32> to vector<8x32xf32>
    %5 = arith.subf %0, %4 : vector<8x32xf32>
    %c0_4 = arith.constant 0 : index
    %c0_5 = arith.constant 0 : index
    %c0_6 = arith.constant 0 : index
    %6 = vector.load %arg2[%c0_4, %c0_5, %c0_6] : memref<4x1x32xf32, #tpu.memory_space<vmem>>, vector<1x1x32xf32>
    %7 = vector.shape_cast %6 : vector<1x1x32xf32> to vector<1x32xf32>
    %8 = math.exp %7 : vector<1x32xf32>
    %9 = vector.broadcast %8 : vector<1x32xf32> to vector<8x32xf32>
    %10 = arith.mulf %5, %9 : vector<8x32xf32>
    %c0_7 = arith.constant 0 : index
    %c0_8 = arith.constant 0 : index
    %c0_9 = arith.constant 0 : index
    %11 = vector.load %arg3[%c0_7, %c0_8, %c0_9] : memref<4x32x64xf32, #tpu.memory_space<vmem>>, vector<1x32x64xf32>
    %12 = vector.shape_cast %11 : vector<1x32x64xf32> to vector<32x64xf32>
    %cst_10 = arith.constant dense<0.000000e+00> : vector<8x64xf32>
    %13 = tpu.matmul %10, %12, %cst_10 {dimension_numbers = #tpu.dot_dimension_numbers<[1], [0], [0], [1], [0, 0, 1, 1], [], []>} : vector<8x32xf32>, vector<32x64xf32>, vector<8x64xf32> -> vector<8x64xf32>
    %c0_11 = arith.constant 0 : index
    %c0_12 = arith.constant 0 : index
    %c0_13 = arith.constant 0 : index
    %14 = vector.load %arg4[%c0_11, %c0_12, %c0_13] : memref<4x1x64xf32, #tpu.memory_space<vmem>>, vector<1x1x64xf32>
    %15 = vector.shape_cast %14 : vector<1x1x64xf32> to vector<1x64xf32>
    %16 = vector.broadcast %15 : vector<1x64xf32> to vector<8x64xf32>
    %17 = arith.addf %13, %16 : vector<8x64xf32>
    %cst_14 = arith.constant 0.000000e+00 : f32
    %18 = vector.broadcast %cst_14 : f32 to vector<8x64xf32>
    %19 = arith.cmpf oge, %17, %18 : vector<8x64xf32>
    %cst_15 = arith.constant 0.00999999977 : f32
    %20 = vector.broadcast %cst_15 : f32 to vector<8x64xf32>
    %21 = arith.mulf %20, %17 : vector<8x64xf32>
    %22 = arith.select %19, %17, %21 : vector<8x64xi1>, vector<8x64xf32>
    %c0_16 = arith.constant 0 : index
    %c0_17 = arith.constant 0 : index
    %c0_18 = arith.constant 0 : index
    %23 = vector.load %arg5[%c0_16, %c0_17, %c0_18] : memref<4x64x64xf32, #tpu.memory_space<vmem>>, vector<1x64x64xf32>
    %24 = vector.shape_cast %23 : vector<1x64x64xf32> to vector<64x64xf32>
    %cst_19 = arith.constant dense<0.000000e+00> : vector<8x64xf32>
    %25 = tpu.matmul %22, %24, %cst_19 {dimension_numbers = #tpu.dot_dimension_numbers<[1], [0], [0], [1], [0, 0, 1, 1], [], []>} : vector<8x64xf32>, vector<64x64xf32>, vector<8x64xf32> -> vector<8x64xf32>
    %c0_20 = arith.constant 0 : index
    %c0_21 = arith.constant 0 : index
    %c0_22 = arith.constant 0 : index
    %26 = vector.load %arg6[%c0_20, %c0_21, %c0_22] : memref<4x1x64xf32, #tpu.memory_space<vmem>>, vector<1x1x64xf32>
    %27 = vector.shape_cast %26 : vector<1x1x64xf32> to vector<1x64xf32>
    %28 = vector.broadcast %27 : vector<1x64xf32> to vector<8x64xf32>
    %29 = arith.addf %25, %28 : vector<8x64xf32>
    %cst_23 = arith.constant 0.000000e+00 : f32
    %30 = vector.broadcast %cst_23 : f32 to vector<8x64xf32>
    %31 = arith.cmpf oge, %29, %30 : vector<8x64xf32>
    %cst_24 = arith.constant 0.00999999977 : f32
    %32 = vector.broadcast %cst_24 : f32 to vector<8x64xf32>
    %33 = arith.mulf %32, %29 : vector<8x64xf32>
    %34 = arith.select %31, %29, %33 : vector<8x64xi1>, vector<8x64xf32>
    %c0_25 = arith.constant 0 : index
    %c0_26 = arith.constant 0 : index
    %c0_27 = arith.constant 0 : index
    %35 = vector.load %arg7[%c0_25, %c0_26, %c0_27] : memref<4x64x32xf32, #tpu.memory_space<vmem>>, vector<1x64x32xf32>
    %36 = vector.shape_cast %35 : vector<1x64x32xf32> to vector<64x32xf32>
    %cst_28 = arith.constant dense<0.000000e+00> : vector<8x32xf32>
    %37 = tpu.matmul %34, %36, %cst_28 {dimension_numbers = #tpu.dot_dimension_numbers<[1], [0], [0], [1], [0, 0, 1, 1], [], []>} : vector<8x64xf32>, vector<64x32xf32>, vector<8x32xf32> -> vector<8x32xf32>
    %c0_29 = arith.constant 0 : index
    %c0_30 = arith.constant 0 : index
    %c0_31 = arith.constant 0 : index
    %38 = vector.load %arg8[%c0_29, %c0_30, %c0_31] : memref<4x1x32xf32, #tpu.memory_space<vmem>>, vector<1x1x32xf32>
    %39 = vector.shape_cast %38 : vector<1x1x32xf32> to vector<1x32xf32>
    %40 = vector.broadcast %39 : vector<1x32xf32> to vector<8x32xf32>
    %41 = arith.addf %37, %40 : vector<8x32xf32>
    %c0_32 = arith.constant 0 : index
    %c0_33 = arith.constant 0 : index
    %c0_34 = arith.constant 0 : index
    %42 = vector.load %arg9[%c0_32, %c0_33, %c0_34] : memref<4x64x32xf32, #tpu.memory_space<vmem>>, vector<1x64x32xf32>
    %43 = vector.shape_cast %42 : vector<1x64x32xf32> to vector<64x32xf32>
    %cst_35 = arith.constant dense<0.000000e+00> : vector<8x32xf32>
    %44 = tpu.matmul %34, %43, %cst_35 {dimension_numbers = #tpu.dot_dimension_numbers<[1], [0], [0], [1], [0, 0, 1, 1], [], []>} : vector<8x64xf32>, vector<64x32xf32>, vector<8x32xf32> -> vector<8x32xf32>
    %c0_36 = arith.constant 0 : index
    %c0_37 = arith.constant 0 : index
    %c0_38 = arith.constant 0 : index
    %45 = vector.load %arg10[%c0_36, %c0_37, %c0_38] : memref<4x1x32xf32, #tpu.memory_space<vmem>>, vector<1x1x32xf32>
    %46 = vector.shape_cast %45 : vector<1x1x32xf32> to vector<1x32xf32>
    %47 = vector.broadcast %46 : vector<1x32xf32> to vector<8x32xf32>
    %48 = arith.addf %44, %47 : vector<8x32xf32>
    %49 = math.tanh %41 : vector<8x32xf32>
    %50 = math.exp %49 : vector<8x32xf32>
    %51 = arith.mulf %10, %50 : vector<8x32xf32>
    %52 = arith.addf %51, %48 : vector<8x32xf32>
    %cst_39 = arith.constant dense<0.000000e+00> : vector<8xf32>
    %53 = vector.multi_reduction <add>, %49, %cst_39 [1] : vector<8x32xf32> to vector<8xf32>
    %54 = vector.shape_cast %53 : vector<8xf32> to vector<8x1xf32>
    %55 = arith.addf %1, %54 : vector<8x1xf32>
    %c0_40 = arith.constant 0 : index
    %c0_41 = arith.constant 0 : index
    %c0_42 = arith.constant 0 : index
    %56 = vector.load %arg13[%c0_40, %c0_41, %c0_42] : memref<4x8x32xf32, #tpu.memory_space<vmem>>, vector<1x8x32xf32>
    %57 = vector.shape_cast %56 : vector<1x8x32xf32> to vector<8x32xf32>
    %58 = vector.shape_cast %52 : vector<8x32xf32> to vector<1x8x32xf32>
    tpu.vector_store %arg13[%c0_40, %c0_41, %c0_42], %58 {strides = array<i32>} : memref<4x8x32xf32, #tpu.memory_space<vmem>>, vector<1x8x32xf32>,
    %c1 = arith.constant 1 : index
    %c0_43 = arith.constant 0 : index
    %c0_44 = arith.constant 0 : index
    %59 = vector.load %arg1[%c1, %c0_43, %c0_44] : memref<4x1x32xf32, #tpu.memory_space<vmem>>, vector<1x1x32xf32>
    %60 = vector.shape_cast %59 : vector<1x1x32xf32> to vector<1x32xf32>
    %61 = vector.broadcast %60 : vector<1x32xf32> to vector<8x32xf32>
    %62 = arith.subf %52, %61 : vector<8x32xf32>
    %c1_45 = arith.constant 1 : index
    %c0_46 = arith.constant 0 : index
    %c0_47 = arith.constant 0 : index
    %63 = vector.load %arg2[%c1_45, %c0_46, %c0_47] : memref<4x1x32xf32, #tpu.memory_space<vmem>>, vector<1x1x32xf32>
    %64 = vector.shape_cast %63 : vector<1x1x32xf32> to vector<1x32xf32>
    %65 = math.exp %64 : vector<1x32xf32>
    %66 = vector.broadcast %65 : vector<1x32xf32> to vector<8x32xf32>
    %67 = arith.mulf %62, %66 : vector<8x32xf32>
    %c16_i32 = arith.constant 16 : i32
    %68 = tpu.dynamic_rotate %67 by %c16_i32 dim 1 : vector<8x32xf32>, i32 -> vector<8x32xf32>
    %c1_48 = arith.constant 1 : index
    %c0_49 = arith.constant 0 : index
    %c0_50 = arith.constant 0 : index
    %69 = vector.load %arg3[%c1_48, %c0_49, %c0_50] : memref<4x32x64xf32, #tpu.memory_space<vmem>>, vector<1x32x64xf32>
    %70 = vector.shape_cast %69 : vector<1x32x64xf32> to vector<32x64xf32>
    %cst_51 = arith.constant dense<0.000000e+00> : vector<8x64xf32>
    %71 = tpu.matmul %68, %70, %cst_51 {dimension_numbers = #tpu.dot_dimension_numbers<[1], [0], [0], [1], [0, 0, 1, 1], [], []>} : vector<8x32xf32>, vector<32x64xf32>, vector<8x64xf32> -> vector<8x64xf32>
    %c1_52 = arith.constant 1 : index
    %c0_53 = arith.constant 0 : index
    %c0_54 = arith.constant 0 : index
    %72 = vector.load %arg4[%c1_52, %c0_53, %c0_54] : memref<4x1x64xf32, #tpu.memory_space<vmem>>, vector<1x1x64xf32>
    %73 = vector.shape_cast %72 : vector<1x1x64xf32> to vector<1x64xf32>
    %74 = vector.broadcast %73 : vector<1x64xf32> to vector<8x64xf32>
    %75 = arith.addf %71, %74 : vector<8x64xf32>
    %cst_55 = arith.constant 0.000000e+00 : f32
    %76 = vector.broadcast %cst_55 : f32 to vector<8x64xf32>
    %77 = arith.cmpf oge, %75, %76 : vector<8x64xf32>
    %cst_56 = arith.constant 0.00999999977 : f32
    %78 = vector.broadcast %cst_56 : f32 to vector<8x64xf32>
    %79 = arith.mulf %78, %75 : vector<8x64xf32>
    %80 = arith.select %77, %75, %79 : vector<8x64xi1>, vector<8x64xf32>
    %c1_57 = arith.constant 1 : index
    %c0_58 = arith.constant 0 : index
    %c0_59 = arith.constant 0 : index
    %81 = vector.load %arg5[%c1_57, %c0_58, %c0_59] : memref<4x64x64xf32, #tpu.memory_space<vmem>>, vector<1x64x64xf32>
    %82 = vector.shape_cast %81 : vector<1x64x64xf32> to vector<64x64xf32>
    %cst_60 = arith.constant dense<0.000000e+00> : vector<8x64xf32>
    %83 = tpu.matmul %80, %82, %cst_60 {dimension_numbers = #tpu.dot_dimension_numbers<[1], [0], [0], [1], [0, 0, 1, 1], [], []>} : vector<8x64xf32>, vector<64x64xf32>, vector<8x64xf32> -> vector<8x64xf32>
    %c1_61 = arith.constant 1 : index
    %c0_62 = arith.constant 0 : index
    %c0_63 = arith.constant 0 : index
    %84 = vector.load %arg6[%c1_61, %c0_62, %c0_63] : memref<4x1x64xf32, #tpu.memory_space<vmem>>, vector<1x1x64xf32>
    %85 = vector.shape_cast %84 : vector<1x1x64xf32> to vector<1x64xf32>
    %86 = vector.broadcast %85 : vector<1x64xf32> to vector<8x64xf32>
    %87 = arith.addf %83, %86 : vector<8x64xf32>
    %cst_64 = arith.constant 0.000000e+00 : f32
    %88 = vector.broadcast %cst_64 : f32 to vector<8x64xf32>
    %89 = arith.cmpf oge, %87, %88 : vector<8x64xf32>
    %cst_65 = arith.constant 0.00999999977 : f32
    %90 = vector.broadcast %cst_65 : f32 to vector<8x64xf32>
    %91 = arith.mulf %90, %87 : vector<8x64xf32>
    %92 = arith.select %89, %87, %91 : vector<8x64xi1>, vector<8x64xf32>
    %c1_66 = arith.constant 1 : index
    %c0_67 = arith.constant 0 : index
    %c0_68 = arith.constant 0 : index
    %93 = vector.load %arg7[%c1_66, %c0_67, %c0_68] : memref<4x64x32xf32, #tpu.memory_space<vmem>>, vector<1x64x32xf32>
    %94 = vector.shape_cast %93 : vector<1x64x32xf32> to vector<64x32xf32>
    %cst_69 = arith.constant dense<0.000000e+00> : vector<8x32xf32>
    %95 = tpu.matmul %92, %94, %cst_69 {dimension_numbers = #tpu.dot_dimension_numbers<[1], [0], [0], [1], [0, 0, 1, 1], [], []>} : vector<8x64xf32>, vector<64x32xf32>, vector<8x32xf32> -> vector<8x32xf32>
    %c1_70 = arith.constant 1 : index
    %c0_71 = arith.constant 0 : index
    %c0_72 = arith.constant 0 : index
    %96 = vector.load %arg8[%c1_70, %c0_71, %c0_72] : memref<4x1x32xf32, #tpu.memory_space<vmem>>, vector<1x1x32xf32>
    %97 = vector.shape_cast %96 : vector<1x1x32xf32> to vector<1x32xf32>
    %98 = vector.broadcast %97 : vector<1x32xf32> to vector<8x32xf32>
    %99 = arith.addf %95, %98 : vector<8x32xf32>
    %c1_73 = arith.constant 1 : index
    %c0_74 = arith.constant 0 : index
    %c0_75 = arith.constant 0 : index
    %100 = vector.load %arg9[%c1_73, %c0_74, %c0_75] : memref<4x64x32xf32, #tpu.memory_space<vmem>>, vector<1x64x32xf32>
    %101 = vector.shape_cast %100 : vector<1x64x32xf32> to vector<64x32xf32>
    %cst_76 = arith.constant dense<0.000000e+00> : vector<8x32xf32>
    %102 = tpu.matmul %92, %101, %cst_76 {dimension_numbers = #tpu.dot_dimension_numbers<[1], [0], [0], [1], [0, 0, 1, 1], [], []>} : vector<8x64xf32>, vector<64x32xf32>, vector<8x32xf32> -> vector<8x32xf32>
    %c1_77 = arith.constant 1 : index
    %c0_78 = arith.constant 0 : index
    %c0_79 = arith.constant 0 : index
    %103 = vector.load %arg10[%c1_77, %c0_78, %c0_79] : memref<4x1x32xf32, #tpu.memory_space<vmem>>, vector<1x1x32xf32>
    %104 = vector.shape_cast %103 : vector<1x1x32xf32> to vector<1x32xf32>
    %105 = vector.broadcast %104 : vector<1x32xf32> to vector<8x32xf32>
    %106 = arith.addf %102, %105 : vector<8x32xf32>
    %107 = math.tanh %99 : vector<8x32xf32>
    %108 = math.exp %107 : vector<8x32xf32>
    %109 = arith.mulf %68, %108 : vector<8x32xf32>
    %110 = arith.addf %109, %106 : vector<8x32xf32>
    %cst_80 = arith.constant dense<0.000000e+00> : vector<8xf32>
    %111 = vector.multi_reduction <add>, %107, %cst_80 [1] : vector<8x32xf32> to vector<8xf32>
    %112 = vector.shape_cast %111 : vector<8xf32> to vector<8x1xf32>
    %113 = arith.addf %55, %112 : vector<8x1xf32>
    %c1_81 = arith.constant 1 : index
    %c0_82 = arith.constant 0 : index
    %c0_83 = arith.constant 0 : index
    %114 = vector.load %arg13[%c1_81, %c0_82, %c0_83] : memref<4x8x32xf32, #tpu.memory_space<vmem>>, vector<1x8x32xf32>
    %115 = vector.shape_cast %114 : vector<1x8x32xf32> to vector<8x32xf32>
    %116 = vector.shape_cast %110 : vector<8x32xf32> to vector<1x8x32xf32>
    tpu.vector_store %arg13[%c1_81, %c0_82, %c0_83], %116 {strides = array<i32>} : memref<4x8x32xf32, #tpu.memory_space<vmem>>, vector<1x8x32xf32>,
    %c2 = arith.constant 2 : index
    %c0_84 = arith.constant 0 : index
    %c0_85 = arith.constant 0 : index
    %117 = vector.load %arg1[%c2, %c0_84, %c0_85] : memref<4x1x32xf32, #tpu.memory_space<vmem>>, vector<1x1x32xf32>
    %118 = vector.shape_cast %117 : vector<1x1x32xf32> to vector<1x32xf32>
    %119 = vector.broadcast %118 : vector<1x32xf32> to vector<8x32xf32>
    %120 = arith.subf %110, %119 : vector<8x32xf32>
    %c2_86 = arith.constant 2 : index
    %c0_87 = arith.constant 0 : index
    %c0_88 = arith.constant 0 : index
    %121 = vector.load %arg2[%c2_86, %c0_87, %c0_88] : memref<4x1x32xf32, #tpu.memory_space<vmem>>, vector<1x1x32xf32>
    %122 = vector.shape_cast %121 : vector<1x1x32xf32> to vector<1x32xf32>
    %123 = math.exp %122 : vector<1x32xf32>
    %124 = vector.broadcast %123 : vector<1x32xf32> to vector<8x32xf32>
    %125 = arith.mulf %120, %124 : vector<8x32xf32>
    %c2_89 = arith.constant 2 : index
    %c0_90 = arith.constant 0 : index
    %c0_91 = arith.constant 0 : index
    %126 = vector.load %arg3[%c2_89, %c0_90, %c0_91] : memref<4x32x64xf32, #tpu.memory_space<vmem>>, vector<1x32x64xf32>
    %127 = vector.shape_cast %126 : vector<1x32x64xf32> to vector<32x64xf32>
    %cst_92 = arith.constant dense<0.000000e+00> : vector<8x64xf32>
    %128 = tpu.matmul %125, %127, %cst_92 {dimension_numbers = #tpu.dot_dimension_numbers<[1], [0], [0], [1], [0, 0, 1, 1], [], []>} : vector<8x32xf32>, vector<32x64xf32>, vector<8x64xf32> -> vector<8x64xf32>
    %c2_93 = arith.constant 2 : index
    %c0_94 = arith.constant 0 : index
    %c0_95 = arith.constant 0 : index
    %129 = vector.load %arg4[%c2_93, %c0_94, %c0_95] : memref<4x1x64xf32, #tpu.memory_space<vmem>>, vector<1x1x64xf32>
    %130 = vector.shape_cast %129 : vector<1x1x64xf32> to vector<1x64xf32>
    %131 = vector.broadcast %130 : vector<1x64xf32> to vector<8x64xf32>
    %132 = arith.addf %128, %131 : vector<8x64xf32>
    %cst_96 = arith.constant 0.000000e+00 : f32
    %133 = vector.broadcast %cst_96 : f32 to vector<8x64xf32>
    %134 = arith.cmpf oge, %132, %133 : vector<8x64xf32>
    %cst_97 = arith.constant 0.00999999977 : f32
    %135 = vector.broadcast %cst_97 : f32 to vector<8x64xf32>
    %136 = arith.mulf %135, %132 : vector<8x64xf32>
    %137 = arith.select %134, %132, %136 : vector<8x64xi1>, vector<8x64xf32>
    %c2_98 = arith.constant 2 : index
    %c0_99 = arith.constant 0 : index
    %c0_100 = arith.constant 0 : index
    %138 = vector.load %arg5[%c2_98, %c0_99, %c0_100] : memref<4x64x64xf32, #tpu.memory_space<vmem>>, vector<1x64x64xf32>
    %139 = vector.shape_cast %138 : vector<1x64x64xf32> to vector<64x64xf32>
    %cst_101 = arith.constant dense<0.000000e+00> : vector<8x64xf32>
    %140 = tpu.matmul %137, %139, %cst_101 {dimension_numbers = #tpu.dot_dimension_numbers<[1], [0], [0], [1], [0, 0, 1, 1], [], []>} : vector<8x64xf32>, vector<64x64xf32>, vector<8x64xf32> -> vector<8x64xf32>
    %c2_102 = arith.constant 2 : index
    %c0_103 = arith.constant 0 : index
    %c0_104 = arith.constant 0 : index
    %141 = vector.load %arg6[%c2_102, %c0_103, %c0_104] : memref<4x1x64xf32, #tpu.memory_space<vmem>>, vector<1x1x64xf32>
    %142 = vector.shape_cast %141 : vector<1x1x64xf32> to vector<1x64xf32>
    %143 = vector.broadcast %142 : vector<1x64xf32> to vector<8x64xf32>
    %144 = arith.addf %140, %143 : vector<8x64xf32>
    %cst_105 = arith.constant 0.000000e+00 : f32
    %145 = vector.broadcast %cst_105 : f32 to vector<8x64xf32>
    %146 = arith.cmpf oge, %144, %145 : vector<8x64xf32>
    %cst_106 = arith.constant 0.00999999977 : f32
    %147 = vector.broadcast %cst_106 : f32 to vector<8x64xf32>
    %148 = arith.mulf %147, %144 : vector<8x64xf32>
    %149 = arith.select %146, %144, %148 : vector<8x64xi1>, vector<8x64xf32>
    %c2_107 = arith.constant 2 : index
    %c0_108 = arith.constant 0 : index
    %c0_109 = arith.constant 0 : index
    %150 = vector.load %arg7[%c2_107, %c0_108, %c0_109] : memref<4x64x32xf32, #tpu.memory_space<vmem>>, vector<1x64x32xf32>
    %151 = vector.shape_cast %150 : vector<1x64x32xf32> to vector<64x32xf32>
    %cst_110 = arith.constant dense<0.000000e+00> : vector<8x32xf32>
    %152 = tpu.matmul %149, %151, %cst_110 {dimension_numbers = #tpu.dot_dimension_numbers<[1], [0], [0], [1], [0, 0, 1, 1], [], []>} : vector<8x64xf32>, vector<64x32xf32>, vector<8x32xf32> -> vector<8x32xf32>
    %c2_111 = arith.constant 2 : index
    %c0_112 = arith.constant 0 : index
    %c0_113 = arith.constant 0 : index
    %153 = vector.load %arg8[%c2_111, %c0_112, %c0_113] : memref<4x1x32xf32, #tpu.memory_space<vmem>>, vector<1x1x32xf32>
    %154 = vector.shape_cast %153 : vector<1x1x32xf32> to vector<1x32xf32>
    %155 = vector.broadcast %154 : vector<1x32xf32> to vector<8x32xf32>
    %156 = arith.addf %152, %155 : vector<8x32xf32>
    %c2_114 = arith.constant 2 : index
    %c0_115 = arith.constant 0 : index
    %c0_116 = arith.constant 0 : index
    %157 = vector.load %arg9[%c2_114, %c0_115, %c0_116] : memref<4x64x32xf32, #tpu.memory_space<vmem>>, vector<1x64x32xf32>
    %158 = vector.shape_cast %157 : vector<1x64x32xf32> to vector<64x32xf32>
    %cst_117 = arith.constant dense<0.000000e+00> : vector<8x32xf32>
    %159 = tpu.matmul %149, %158, %cst_117 {dimension_numbers = #tpu.dot_dimension_numbers<[1], [0], [0], [1], [0, 0, 1, 1], [], []>} : vector<8x64xf32>, vector<64x32xf32>, vector<8x32xf32> -> vector<8x32xf32>
    %c2_118 = arith.constant 2 : index
    %c0_119 = arith.constant 0 : index
    %c0_120 = arith.constant 0 : index
    %160 = vector.load %arg10[%c2_118, %c0_119, %c0_120] : memref<4x1x32xf32, #tpu.memory_space<vmem>>, vector<1x1x32xf32>
    %161 = vector.shape_cast %160 : vector<1x1x32xf32> to vector<1x32xf32>
    %162 = vector.broadcast %161 : vector<1x32xf32> to vector<8x32xf32>
    %163 = arith.addf %159, %162 : vector<8x32xf32>
    %164 = math.tanh %156 : vector<8x32xf32>
    %165 = math.exp %164 : vector<8x32xf32>
    %166 = arith.mulf %125, %165 : vector<8x32xf32>
    %167 = arith.addf %166, %163 : vector<8x32xf32>
    %cst_121 = arith.constant dense<0.000000e+00> : vector<8xf32>
    %168 = vector.multi_reduction <add>, %164, %cst_121 [1] : vector<8x32xf32> to vector<8xf32>
    %169 = vector.shape_cast %168 : vector<8xf32> to vector<8x1xf32>
    %170 = arith.addf %113, %169 : vector<8x1xf32>
    %c2_122 = arith.constant 2 : index
    %c0_123 = arith.constant 0 : index
    %c0_124 = arith.constant 0 : index
    %171 = vector.load %arg13[%c2_122, %c0_123, %c0_124] : memref<4x8x32xf32, #tpu.memory_space<vmem>>, vector<1x8x32xf32>
    %172 = vector.shape_cast %171 : vector<1x8x32xf32> to vector<8x32xf32>
    %173 = vector.shape_cast %167 : vector<8x32xf32> to vector<1x8x32xf32>
    tpu.vector_store %arg13[%c2_122, %c0_123, %c0_124], %173 {strides = array<i32>} : memref<4x8x32xf32, #tpu.memory_space<vmem>>, vector<1x8x32xf32>,
    %c3 = arith.constant 3 : index
    %c0_125 = arith.constant 0 : index
    %c0_126 = arith.constant 0 : index
    %174 = vector.load %arg1[%c3, %c0_125, %c0_126] : memref<4x1x32xf32, #tpu.memory_space<vmem>>, vector<1x1x32xf32>
    %175 = vector.shape_cast %174 : vector<1x1x32xf32> to vector<1x32xf32>
    %176 = vector.broadcast %175 : vector<1x32xf32> to vector<8x32xf32>
    %177 = arith.subf %167, %176 : vector<8x32xf32>
    %c3_127 = arith.constant 3 : index
    %c0_128 = arith.constant 0 : index
    %c0_129 = arith.constant 0 : index
    %178 = vector.load %arg2[%c3_127, %c0_128, %c0_129] : memref<4x1x32xf32, #tpu.memory_space<vmem>>, vector<1x1x32xf32>
    %179 = vector.shape_cast %178 : vector<1x1x32xf32> to vector<1x32xf32>
    %180 = math.exp %179 : vector<1x32xf32>
    %181 = vector.broadcast %180 : vector<1x32xf32> to vector<8x32xf32>
    %182 = arith.mulf %177, %181 : vector<8x32xf32>
    %c16_i32_130 = arith.constant 16 : i32
    %183 = tpu.dynamic_rotate %182 by %c16_i32_130 dim 1 : vector<8x32xf32>, i32 -> vector<8x32xf32>
    %c3_131 = arith.constant 3 : index
    %c0_132 = arith.constant 0 : index
    %c0_133 = arith.constant 0 : index
    %184 = vector.load %arg3[%c3_131, %c0_132, %c0_133] : memref<4x32x64xf32, #tpu.memory_space<vmem>>, vector<1x32x64xf32>
    %185 = vector.shape_cast %184 : vector<1x32x64xf32> to vector<32x64xf32>
    %cst_134 = arith.constant dense<0.000000e+00> : vector<8x64xf32>
    %186 = tpu.matmul %183, %185, %cst_134 {dimension_numbers = #tpu.dot_dimension_numbers<[1], [0], [0], [1], [0, 0, 1, 1], [], []>} : vector<8x32xf32>, vector<32x64xf32>, vector<8x64xf32> -> vector<8x64xf32>
    %c3_135 = arith.constant 3 : index
    %c0_136 = arith.constant 0 : index
    %c0_137 = arith.constant 0 : index
    %187 = vector.load %arg4[%c3_135, %c0_136, %c0_137] : memref<4x1x64xf32, #tpu.memory_space<vmem>>, vector<1x1x64xf32>
    %188 = vector.shape_cast %187 : vector<1x1x64xf32> to vector<1x64xf32>
    %189 = vector.broadcast %188 : vector<1x64xf32> to vector<8x64xf32>
    %190 = arith.addf %186, %189 : vector<8x64xf32>
    %cst_138 = arith.constant 0.000000e+00 : f32
    %191 = vector.broadcast %cst_138 : f32 to vector<8x64xf32>
    %192 = arith.cmpf oge, %190, %191 : vector<8x64xf32>
    %cst_139 = arith.constant 0.00999999977 : f32
    %193 = vector.broadcast %cst_139 : f32 to vector<8x64xf32>
    %194 = arith.mulf %193, %190 : vector<8x64xf32>
    %195 = arith.select %192, %190, %194 : vector<8x64xi1>, vector<8x64xf32>
    %c3_140 = arith.constant 3 : index
    %c0_141 = arith.constant 0 : index
    %c0_142 = arith.constant 0 : index
    %196 = vector.load %arg5[%c3_140, %c0_141, %c0_142] : memref<4x64x64xf32, #tpu.memory_space<vmem>>, vector<1x64x64xf32>
    %197 = vector.shape_cast %196 : vector<1x64x64xf32> to vector<64x64xf32>
    %cst_143 = arith.constant dense<0.000000e+00> : vector<8x64xf32>
    %198 = tpu.matmul %195, %197, %cst_143 {dimension_numbers = #tpu.dot_dimension_numbers<[1], [0], [0], [1], [0, 0, 1, 1], [], []>} : vector<8x64xf32>, vector<64x64xf32>, vector<8x64xf32> -> vector<8x64xf32>
    %c3_144 = arith.constant 3 : index
    %c0_145 = arith.constant 0 : index
    %c0_146 = arith.constant 0 : index
    %199 = vector.load %arg6[%c3_144, %c0_145, %c0_146] : memref<4x1x64xf32, #tpu.memory_space<vmem>>, vector<1x1x64xf32>
    %200 = vector.shape_cast %199 : vector<1x1x64xf32> to vector<1x64xf32>
    %201 = vector.broadcast %200 : vector<1x64xf32> to vector<8x64xf32>
    %202 = arith.addf %198, %201 : vector<8x64xf32>
    %cst_147 = arith.constant 0.000000e+00 : f32
    %203 = vector.broadcast %cst_147 : f32 to vector<8x64xf32>
    %204 = arith.cmpf oge, %202, %203 : vector<8x64xf32>
    %cst_148 = arith.constant 0.00999999977 : f32
    %205 = vector.broadcast %cst_148 : f32 to vector<8x64xf32>
    %206 = arith.mulf %205, %202 : vector<8x64xf32>
    %207 = arith.select %204, %202, %206 : vector<8x64xi1>, vector<8x64xf32>
    %c3_149 = arith.constant 3 : index
    %c0_150 = arith.constant 0 : index
    %c0_151 = arith.constant 0 : index
    %208 = vector.load %arg7[%c3_149, %c0_150, %c0_151] : memref<4x64x32xf32, #tpu.memory_space<vmem>>, vector<1x64x32xf32>
    %209 = vector.shape_cast %208 : vector<1x64x32xf32> to vector<64x32xf32>
    %cst_152 = arith.constant dense<0.000000e+00> : vector<8x32xf32>
    %210 = tpu.matmul %207, %209, %cst_152 {dimension_numbers = #tpu.dot_dimension_numbers<[1], [0], [0], [1], [0, 0, 1, 1], [], []>} : vector<8x64xf32>, vector<64x32xf32>, vector<8x32xf32> -> vector<8x32xf32>
    %c3_153 = arith.constant 3 : index
    %c0_154 = arith.constant 0 : index
    %c0_155 = arith.constant 0 : index
    %211 = vector.load %arg8[%c3_153, %c0_154, %c0_155] : memref<4x1x32xf32, #tpu.memory_space<vmem>>, vector<1x1x32xf32>
    %212 = vector.shape_cast %211 : vector<1x1x32xf32> to vector<1x32xf32>
    %213 = vector.broadcast %212 : vector<1x32xf32> to vector<8x32xf32>
    %214 = arith.addf %210, %213 : vector<8x32xf32>
    %c3_156 = arith.constant 3 : index
    %c0_157 = arith.constant 0 : index
    %c0_158 = arith.constant 0 : index
    %215 = vector.load %arg9[%c3_156, %c0_157, %c0_158] : memref<4x64x32xf32, #tpu.memory_space<vmem>>, vector<1x64x32xf32>
    %216 = vector.shape_cast %215 : vector<1x64x32xf32> to vector<64x32xf32>
    %cst_159 = arith.constant dense<0.000000e+00> : vector<8x32xf32>
    %217 = tpu.matmul %207, %216, %cst_159 {dimension_numbers = #tpu.dot_dimension_numbers<[1], [0], [0], [1], [0, 0, 1, 1], [], []>} : vector<8x64xf32>, vector<64x32xf32>, vector<8x32xf32> -> vector<8x32xf32>
    %c3_160 = arith.constant 3 : index
    %c0_161 = arith.constant 0 : index
    %c0_162 = arith.constant 0 : index
    %218 = vector.load %arg10[%c3_160, %c0_161, %c0_162] : memref<4x1x32xf32, #tpu.memory_space<vmem>>, vector<1x1x32xf32>
    %219 = vector.shape_cast %218 : vector<1x1x32xf32> to vector<1x32xf32>
    %220 = vector.broadcast %219 : vector<1x32xf32> to vector<8x32xf32>
    %221 = arith.addf %217, %220 : vector<8x32xf32>
    %222 = math.tanh %214 : vector<8x32xf32>
    %223 = math.exp %222 : vector<8x32xf32>
    %224 = arith.mulf %183, %223 : vector<8x32xf32>
    %225 = arith.addf %224, %221 : vector<8x32xf32>
    %cst_163 = arith.constant dense<0.000000e+00> : vector<8xf32>
    %226 = vector.multi_reduction <add>, %222, %cst_163 [1] : vector<8x32xf32> to vector<8xf32>
    %227 = vector.shape_cast %226 : vector<8xf32> to vector<8x1xf32>
    %228 = arith.addf %170, %227 : vector<8x1xf32>
    %c3_164 = arith.constant 3 : index
    %c0_165 = arith.constant 0 : index
    %c0_166 = arith.constant 0 : index
    %229 = vector.load %arg13[%c3_164, %c0_165, %c0_166] : memref<4x8x32xf32, #tpu.memory_space<vmem>>, vector<1x8x32xf32>
    %230 = vector.shape_cast %229 : vector<1x8x32xf32> to vector<8x32xf32>
    %231 = vector.shape_cast %225 : vector<8x32xf32> to vector<1x8x32xf32>
    tpu.vector_store %arg13[%c3_164, %c0_165, %c0_166], %231 {strides = array<i32>} : memref<4x8x32xf32, #tpu.memory_space<vmem>>, vector<1x8x32xf32>,
    %c0_167 = arith.constant 0 : index
    %c0_168 = arith.constant 0 : index
    %232 = vector.load %arg11[%c0_167, %c0_168] : memref<8x32xf32, #tpu.memory_space<vmem>>, vector<8x32xf32>
    tpu.vector_store %arg11[%c0_167, %c0_168], %225 {strides = array<i32>} : memref<8x32xf32, #tpu.memory_space<vmem>>, vector<8x32xf32>,
    %c0_169 = arith.constant 0 : index
    %c0_170 = arith.constant 0 : index
    %233 = vector.load %arg12[%c0_169, %c0_170] : memref<8x1xf32, #tpu.memory_space<vmem>>, vector<8x1xf32>
    tpu.vector_store %arg12[%c0_169, %c0_170], %228 {strides = array<i32>} : memref<8x1xf32, #tpu.memory_space<vmem>>, vector<8x1xf32>,
    return
  }
}

</mosaic_0001>

<bundles_post_ra>
// kernel: transformer_model_forward.1
= control target key start
LH: loop header
LB: loop body
LE: loop exit
PB: predicated region body
PF: predicated region fallthrough
CT: control target
= control target key end

     0   :  { %19 = vsyncpa [#allocation3], 0  ;;  %v2487_v3 = vmov 0.0|0.0   ;;  %vm2488_vm0 = vmmov 0   ;;  %v2489_v6 = vmov 0.0   ;;  %v56_v10 = vlaneseq  ;;  %s3192_s0 = inlined_call_operand.vmem [shape: f32[8,32], index: 0, kind: input, shape index: {}]   ;;  %s3193_s1 = inlined_call_operand.vmem [shape: f32[4,1,32], index: 1, kind: input, shape index: {}]   ;;  %s3194_s2 = inlined_call_operand.vmem [shape: f32[4,1,32], index: 2, kind: input, shape index: {}]   ;;  %s3195_s3 = inlined_call_operand.vmem [shape: f32[4,32,64], index: 3, kind: input, shape index: {}]   ;;  %s3196_s4 = inlined_call_operand.vmem [shape: f32[4,1,64], index: 4, kind: input, shape index: {}]   ;;  %s3197_s5 = inlined_call_operand.vmem [shape: f32[4,64,64], index: 5, kind: input, shape index: {}]   ;;  %s3198_s6 = inlined_call_operand.vmem [shape: f32[4,1,64], index: 6, kind: input, shape index: {}]   ;;  %s3199_s7 = inlined_call_operand.vmem [shape: f32[4,64,32], index: 7, kind: input, shape index: {}]   ;;  %s3200_s8 = inlined_call_operand.vmem [shape: f32[4,1,32], index: 8, kind: input, shape index: {}]   ;;  %s3201_s9 = inlined_call_operand.vmem [shape: f32[4,64,32], index: 9, kind: input, shape index: {}]   ;;  %s3202_s10 = inlined_call_operand.vmem [shape: f32[4,1,32], index: 10, kind: input, shape index: {}]   ;;  %s3203_s11 = inlined_call_operand.hbm [shape: f32[8,32], index: 11, kind: output, shape index: {0}]   ;;  %s3204_s12 = inlined_call_operand.vmem [shape: f32[8,1], index: 12, kind: output, shape index: {1}]   ;;  %s3205_s13 = inlined_call_operand.hbm [shape: f32[4,8,32], index: 13, kind: output, shape index: {2}]  }
   0x1   :  { %v62_v0 = vld [vmem:[%s3195_s3] sm:$0xff]  ;;  %v63_v1 = vld [vmem:[%s3195_s3 + $0x8] sm:$0xff]  ;;  %v64_v2 = vld [vmem:[%s3195_s3 + $0x10] sm:$0xff]  ;;  %2237 = vmatprep.subr.bf16.mxu1 %v2487_v3  ;;  %1973 = vmatprep.mubr.msk.f32.mxu1 %vm2488_vm0, %v2489_v6 }
   0x2   :  { %v2238_v4 = vpack.c.bf16 %v63_v1, %v62_v0  ;;  %v65_v5 = vld [vmem:[%s3195_s3 + $0x18] sm:$0xff]  ;;  %v52_v7 = vld [vmem:[%s3194_s2] sm:$0x1]  ;;  %2255 = vmatprep.subr.bf16.mxu0 %v2487_v3  ;;  %2011 = vmatprep.mubr.msk.f32.mxu0 %vm2488_vm0, %v2489_v6 }
   0x3   :  { %v2241_v8 = vpack.c.bf16 %v65_v5, %v64_v2  ;;  %v53_v9 = vmul.f32 1.442695, %v52_v7 }
   0x4   :  { %2239 = vmatpush3.bf16.msra.mxu1 %v2238_v4 }
   0x5   :  { %2240 = vmatprep.subr.bf16.mxu1 %v2487_v3 }
   0x6   :  { %20 = vsyncpa [#allocation5], 0  ;;  %2415 = vpow2.f32 %v53_v9  ;;  %v57_v11 = vshrl.u32 %v56_v10, 7  ;;  %v43_v12 = vld [vmem:[%s3192_s0] sm:$0xff]  ;;  %v151_v17 = vld [vmem:[%s3197_s5 + $0x8] sm:$0xff]  ;;  %vm73_vm1 = vcmask 261120  }
   0x7   :  { %v1699_v13 = vld [vmem:[%s3193_s1] ss:$0 sm:$0xff]  ;;  %v152_v22 = vld [vmem:[%s3197_s5 + $0x10] sm:$0xff]  ;;  %v153_v23 = vld [vmem:[%s3197_s5 + $0x18] sm:$0xff]  ;;  %vm165_vm3 = vcmask 523264   ;;  %s2490_s27 = smov 32  }
   0x8   :  { %2242 = vmatpush3.bf16.msra.mxu1 %v2241_v8  ;;  %v2596_v14 = vsub.s32 0, %v57_v11  ;;  %v51_v15 = vsub.f32 %v43_v12, %v1699_v13  ;;  %v150_v16 = vld [vmem:[%s3197_s5] sm:$0xff]  ;;  %v2247_v24 = vpack.c.bf16 %v153_v23, %v152_v22  ;;  %v155_v26 = vld [vmem:[%s3197_s5 + $0x28] sm:$0xff]  ;;  %v156_v28 = vld [vmem:[%s3197_s5 + $0x30] sm:$0xff]  ;;  %vm445_vm5 = vcmask 1047808   ;;  %s2491_s19 = smov 112  }
   0x9   :  { %2243 = vmatprep.subr.bf16.mxu1 %v2487_v3  ;;  %v2244_v20 = vpack.c.bf16 %v151_v17, %v150_v16  ;;  %v154_v25 = vld [vmem:[%s3197_s5 + $0x20] sm:$0xff]  ;;  %v157_v29 = vld [vmem:[%s3197_s5 + $0x38] sm:$0xff]  ;;  %v243_v32 = vld [vmem:[%s3199_s7 + $0x8] sm:$0xff]  ;;  %s2492_s30 = smov 16   ;;  %vm1663_vm12 = vcmask 7168  }
   0xa   :  { %v2250_v27 = vpack.c.bf16 %v155_v26, %v154_v25  ;;  %v2253_v30 = vpack.c.bf16 %v157_v29, %v156_v28  ;;  %v242_v31 = vld [vmem:[%s3199_s7] sm:$0xff]  ;;  %v244_v34 = vld [vmem:[%s3199_s7 + $0x10] sm:$0xff]  ;;  %v245_v35 = vld [vmem:[%s3199_s7 + $0x18] sm:$0xff] }
   0xb   :  { %v2256_v33 = vpack.c.bf16 %v243_v32, %v242_v31  ;;  %v2259_v36 = vpack.c.bf16 %v245_v35, %v244_v34  ;;  %v246_v37 = vld [vmem:[%s3199_s7 + $0x20] sm:$0xff]  ;;  %v247_v38 = vld [vmem:[%s3199_s7 + $0x28] sm:$0xff]  ;;  %v332_v48 = vld [vmem:[%s3201_s9 + $0x10] sm:$0xff] }
   0xc   :  { %v2262_v39 = vpack.c.bf16 %v247_v38, %v246_v37  ;;  %v1700_v40 = vld [vmem:[%s3196_s4] ss:$0 sm:$0xff]  ;;  %v331_v43 = vld [vmem:[%s3201_s9 + $0x8] sm:$0xff]  ;;  %v333_v49 = vld [vmem:[%s3201_s9 + $0x18] sm:$0xff] }
   0xd   :  { %2257 = vmatpush3.bf16.msra.mxu0 %v2256_v33  ;;  %v330_v42 = vld [vmem:[%s3201_s9] sm:$0xff]  ;;  %v2271_v51 = vpack.c.bf16 %v333_v49, %v332_v48  ;;  %v335_v53 = vld [vmem:[%s3201_s9 + $0x28] sm:$0xff]  ;;  %v248_v55 = vld [vmem:[%s3199_s7 + $0x30] sm:$0xff] }
   0xe   :  { %2258 = vmatprep.subr.bf16.mxu0 %v2487_v3  ;;  %v2268_v47 = vpack.c.bf16 %v331_v43, %v330_v42  ;;  %v334_v52 = vld [vmem:[%s3201_s9 + $0x20] sm:$0xff]  ;;  %v249_v56 = vld [vmem:[%s3199_s7 + $0x38] sm:$0xff]  ;;  %v336_v57 = vld [vmem:[%s3201_s9 + $0x30] sm:$0xff] }
   0xf   :  { %v2274_v54 = vpack.c.bf16 %v335_v53, %v334_v52  ;;  %v2265_v58 = vpack.c.bf16 %v249_v56, %v248_v55  ;;  %v337_v59 = vld [vmem:[%s3201_s9 + $0x38] sm:$0xff]  ;;  %v1702_v61 = vld [vmem:[%s3198_s6] ss:$0 sm:$0xff]  ;;  %v1710_v11 = vld [vmem:[%s3194_s2 + $0x1] sm:$0x1] }
  0x10   :  { %v2416_v18 = vpop.eup %2415  ;;  %v2277_v60 = vpack.c.bf16 %v337_v59, %v336_v57  ;;  %v1704_v4 = vld [vmem:[%s3200_s8] ss:$0 sm:$0xff]  ;;  %v436_v12 = vmul.f32 1.442695, %v1710_v11  ;;  %v1709_v22 = vld [vmem:[%s3193_s1 + $0x1] ss:$0 sm:$0xff] }
  0x11   :  { %v59_v19 = vrot.slane %v2416_v18, %v2596_v14  ;;  %2260 = vmatpush3.bf16.msra.mxu0 %v2259_v36  ;;  %v1706_v16 = vld [vmem:[%s3202_s10] ss:$0 sm:$0xff]  ;;  %v1713_v28 = vld [vmem:[%s3195_s3 + $0x30] sm:$0xff]  ;;  %v1719_v37 = vld [vmem:[%s3197_s5 + $0x48] sm:$0xff] }
  0x12   :  { %2261 = vmatprep.subr.bf16.mxu0 %v2487_v3  ;;  %v1718_v36 = vld [vmem:[%s3197_s5 + $0x40] sm:$0xff]  ;;  %v1731_v52 = vld [vmem:[%s3199_s7 + $0x50] sm:$0xff]  ;;  %v1732_v53 = vld [vmem:[%s3199_s7 + $0x58] sm:$0xff] }
  0x13   :  { %v2605_v21 = vmul.f32 %v59_v19, %v51_v15  ;;  %v2286_v38 = vpack.c.bf16 %v1719_v37, %v1718_v36  ;;  %v1722_v43 = vld [vmem:[%s3197_s5 + $0x60] sm:$0xff]  ;;  %v1734_v56 = vld [vmem:[%s3199_s7 + $0x68] sm:$0xff]  ;;  %v1735_v11 = vld [vmem:[%s3199_s7 + $0x70] sm:$0xff] }
  0x14   :  { %v1729_v49 = vld [vmem:[%s3199_s7 + $0x40] sm:$0xff] }
  0x15   :  { %1974 = vmatmul.mubr.msk.f32.vlgmr.msra.gmra.mrb[0].mxu1 %vm73_vm1, %v2605_v21  ;;  %2263 = vmatpush3.bf16.msra.mxu0 %v2262_v39  ;;  %v1720_v39 = vld [vmem:[%s3197_s5 + $0x50] sm:$0xff]  ;;  %v1733_v55 = vld [vmem:[%s3199_s7 + $0x60] sm:$0xff] }
  0x16   :  { %2245 = vmatpush3.bf16.msra.mxu1 %v2244_v20  ;;  %1992 = vmatprep.mubr.msk.f32.mxu1 %vm2488_vm0, %v2489_v6  ;;  %v2304_v57 = vpack.c.bf16 %v1734_v56, %v1733_v55  ;;  %v1761_v56 = vld [vmem:[%s3197_s5 + $0x80] sm:$0xff] }
  0x17   :  { %2246 = vmatprep.subr.bf16.mxu1 %v2487_v3  ;;  %2264 = vmatprep.subr.bf16.mxu0 %v2487_v3 }
  0x19   :  { %2266 = vmatpush3.bf16.msra.mxu0 %v2265_v58  ;;  %v1716_v58 = vld [vmem:[%s3196_s4 + $0x1] ss:$0 sm:$0xff] }
  0x1a   :  { %2248 = vmatpush3.bf16.msra.mxu1 %v2247_v24  ;;  %2279 = vmatprep.subr.bf16.mxu0 %v2487_v3 }
  0x1b   :  { %2249 = vmatprep.subr.bf16.mxu1 %v2487_v3 }
  0x1e   :  { %2251 = vmatpush3.bf16.msra.mxu1 %v2250_v27  ;;  %v1711_v27 = vld [vmem:[%s3195_s3 + $0x20] sm:$0xff] }
  0x1f   :  { %2252 = vmatprep.subr.bf16.mxu1 %v2487_v3 }
  0x22   :  { %2254 = vmatpush3.bf16.msra.mxu1 %v2253_v30  ;;  %v1714_v30 = vld [vmem:[%s3195_s3 + $0x38] sm:$0xff] }
  0x23   :  { %2267 = vmatprep.subr.bf16.mxu1 %v2487_v3  ;;  %v2283_v31 = vpack.c.bf16 %v1714_v30, %v1713_v28  ;;  %v1749_v28 = vld [vmem:[%s3202_s10 + $0x1] ss:$0 sm:$0xff] }
  0xe8   :  { %v143_v41 = vpop.f32.mrb[0].mxu1 }
  0xe9   :  { %v144_v44 = vadd.f32 %v1700_v40, %v143_v41  ;;  %v1975_v45 = vpop.f32.mrb[1].mxu1  ;;  %v1721_v40 = vld [vmem:[%s3197_s5 + $0x58] sm:$0xff] }
  0xea   :  { %v2289_v42 = vpack.c.bf16 %v1721_v40, %v1720_v39  ;;  %v1754_v40 = vld [vmem:[%s3195_s3 + $0x40] sm:$0xff] }
  0xeb   :  { %vm147_vm2 = vcmp.ge.f32.partialorder %v144_v44, 0.0  ;;  %v148_v46 = vmul.f32 0.01, %v144_v44 }
  0xed   :  { %v149_v50 = vsel %vm147_vm2, %v144_v44, %v148_v46  ;;  %v1723_v44 = vld [vmem:[%s3197_s5 + $0x68] sm:$0xff]  ;;  %v1724_v46 = vld [vmem:[%s3197_s5 + $0x70] sm:$0xff] }
  0xee   :  { %1993 = vmatmul.mubr.msk.f32.vlgmr.msra.gmra.mrb[2].mxu1 %vm165_vm3, %v149_v50  ;;  %v2292_v45 = vpack.c.bf16 %v1723_v44, %v1722_v43  ;;  %v1730_v50 = vld [vmem:[%s3199_s7 + $0x48] sm:$0xff]  ;;  %v1757_v44 = vld [vmem:[%s3195_s3 + $0x58] sm:$0xff] }
  0xef   :  { %2269 = vmatpush3.bf16.msra.mxu1 %v2268_v47  ;;  %2030 = vmatprep.mubr.msk.f32.mxu1 %vm2488_vm0, %v2489_v6  ;;  %v1725_v47 = vld [vmem:[%s3197_s5 + $0x78] sm:$0xff] }
  0xf0   :  { %2270 = vmatprep.subr.bf16.mxu1 %v2487_v3  ;;  %v2295_v48 = vpack.c.bf16 %v1725_v47, %v1724_v46  ;;  %v1752_v47 = vld [vmem:[%s3193_s1 + $0x2] ss:$0 sm:$0xff] }
  0xf3   :  { %2272 = vmatpush3.bf16.msra.mxu1 %v2271_v51  ;;  %v2298_v51 = vpack.c.bf16 %v1730_v50, %v1729_v49 }
  0xf4   :  { %2273 = vmatprep.subr.bf16.mxu1 %v2487_v3 }
  0xf7   :  { %2275 = vmatpush3.bf16.msra.mxu1 %v2274_v54  ;;  %v2301_v54 = vpack.c.bf16 %v1732_v53, %v1731_v52 }
  0xf8   :  { %2276 = vmatprep.subr.bf16.mxu1 %v2487_v3 }
  0xfb   :  { %2278 = vmatpush3.bf16.msra.mxu1 %v2277_v60  ;;  %v1740_v60 = vld [vmem:[%s3201_s9 + $0x40] sm:$0xff] }
  0xfc   :  { %2297 = vmatprep.subr.bf16.mxu1 %v2487_v3 }
 0x1c1   :  { %v235_v62 = vpop.f32.mrb[2].mxu1 }
 0x1c2   :  { %v236_v63 = vadd.f32 %v1702_v61, %v235_v62  ;;  %v1994_v0 = vpop.f32.mrb[3].mxu1  ;;  %v1741_v61 = vld [vmem:[%s3201_s9 + $0x48] sm:$0xff] }
 0x1c4   :  { %vm239_vm4 = vcmp.ge.f32.partialorder %v236_v63, 0.0  ;;  %v240_v1 = vmul.f32 0.01, %v236_v63 }
 0x1c6   :  { %v241_v2 = vsel %vm239_vm4, %v236_v63, %v240_v1  ;;  %v2310_v1 = vpack.c.bf16 %v1741_v61, %v1740_v60 }
 0x1c7   :  { %2012 = vmatmul.mubr.msk.f32.vlgmr.msra.gmra.mrb[0].mxu0 %vm165_vm3, %v241_v2  ;;  %2031 = vmatmul.mubr.msk.f32.vlgmr.msra.gmra.mrb[4].mxu1 %vm165_vm3, %v241_v2  ;;  %v1742_v2 = vld [vmem:[%s3201_s9 + $0x50] sm:$0xff] }
 0x1c8   :  { %2041 = vmatprep.mubr.msk.f32.mxu0 %vm2488_vm0, %v2489_v6  ;;  %2079 = vmatprep.mubr.msk.f32.mxu1 %vm2488_vm0, %v2489_v6 }
 0x1c9   :  { %2299 = vmatpush3.bf16.msra.mxu1 %v2298_v51 }
 0x1ca   :  { %2300 = vmatprep.subr.bf16.mxu1 %v2487_v3 }
 0x1cd   :  { %2302 = vmatpush3.bf16.msra.mxu1 %v2301_v54 }
 0x1ce   :  { %2303 = vmatprep.subr.bf16.mxu1 %v2487_v3 }
 0x1d1   :  { %2305 = vmatpush3.bf16.msra.mxu1 %v2304_v57  ;;  %v1762_v57 = vld [vmem:[%s3197_s5 + $0x88] sm:$0xff] }
 0x1d2   :  { %2306 = vmatprep.subr.bf16.mxu1 %v2487_v3 }
 0x29a   :  { %v326_v5 = vpop.f32.mrb[0].mxu0  ;;  %v411_v7 = vpop.f32.mrb[4].mxu1 }
 0x29b   :  { %v327_v8 = vadd.f32 %v1704_v4, %v326_v5  ;;  %v2013_v9 = vpop.f32.mrb[1].mxu0  ;;  %v2032_v10 = vpop.f32.mrb[5].mxu1  ;;  %v412_v19 = vadd.f32 %v1706_v16, %v411_v7  ;;  %v1743_v4 = vld [vmem:[%s3201_s9 + $0x58] sm:$0xff] }
 0x29c   :  { %v2313_v7 = vpack.c.bf16 %v1743_v4, %v1742_v2  ;;  %v1745_v9 = vld [vmem:[%s3201_s9 + $0x68] sm:$0xff]  ;;  %v1768_v2 = vld [vmem:[%s3197_s5 + $0xb8] sm:$0xff] }
 0x29d   :  { %2417 = vtanh.f32 %v327_v8  ;;  %v1744_v8 = vld [vmem:[%s3201_s9 + $0x60] sm:$0xff] }
 0x29e   :  { %2419 = vpow2.f32 %v436_v12  ;;  %v2316_v10 = vpack.c.bf16 %v1745_v9, %v1744_v8  ;;  %v1736_v12 = vld [vmem:[%s3199_s7 + $0x78] sm:$0xff]  ;;  %v1774_v9 = vld [vmem:[%s3199_s7 + $0x90] sm:$0xff] }
 0x29f   :  { %v2307_v16 = vpack.c.bf16 %v1736_v12, %v1735_v11  ;;  %v1776_v12 = vld [vmem:[%s3199_s7 + $0xa0] sm:$0xff] }
 0x2a1   :  { %2308 = vmatpush3.bf16.msra.mxu1 %v2307_v16 }
 0x2a2   :  { %2321 = vmatprep.subr.bf16.mxu1 %v2487_v3 }
 0x2a7   :  { %v2710_v13 = vpop.eup %2417 }
 0x2a8   :  { %v416_v15 = vmul.f32 1.442695, %v2710_v13  ;;  %v2420_v17 = vpop.eup %2419 }
 0x2a9   :  { %v442_v24 = vrot.slane %v2420_v17, %v2596_v14  ;;  %v1747_v17 = vld [vmem:[%s3201_s9 + $0x78] sm:$0xff] }
 0x2aa   :  { %2421 = vpow2.f32 %v416_v15  ;;  %v1746_v15 = vld [vmem:[%s3201_s9 + $0x70] sm:$0xff] }
 0x2b4   :  { %v2422_v18 = vpop.eup %2421 }
 0x2b5   :  { %v418_v20 = vmul.f32 %v2422_v18, %v2605_v21  ;;  %v1712_v21 = vld [vmem:[%s3195_s3 + $0x28] sm:$0xff]  ;;  %v2319_v18 = vpack.c.bf16 %v1747_v17, %v1746_v15  ;;  %v1759_v17 = vld [vmem:[%s3196_s4 + $0x2] ss:$0 sm:$0xff] }
 0x2b6   :  { %v2280_v29 = vpack.c.bf16 %v1712_v21, %v1711_v27  ;;  %v1738_v21 = vld [vmem:[%s3200_s8 + $0x1] ss:$0 sm:$0xff]  ;;  %v1777_v15 = vld [vmem:[%s3199_s7 + $0xa8] sm:$0xff] }
 0x2b7   :  { %v419_v23 = vadd.f32 %v418_v20, %v412_v19  ;;  %v1727_v19 = vld [vmem:[%s3198_s6 + $0x1] ss:$0 sm:$0xff]  ;;  %v2346_v16 = vpack.c.bf16 %v1777_v15, %v1776_v12  ;;  %v1800_v12 = vld [vmem:[%s3195_s3 + $0x78] sm:$0xff] }
 0x2b8   :  { %2281 = vmatpush3.bf16.msra.mxu0 %v2280_v29 }
 0x2b9   :  { %424 = vst.msk [vmem:[#allocation4] sm:$0xff] %vm73_vm1, %v419_v23  ;;  %v433_v25 = vsub.f32 %v419_v23, %v1709_v22  ;;  %2282 = vmatprep.subr.bf16.mxu0 %v2487_v3 }
 0x2bb   :  { %v444_v26 = vmul.f32 %v442_v24, %v433_v25 }
 0x2bc   :  { %2284 = vmatpush3.bf16.msra.mxu0 %v2283_v31 }
 0x2bd   :  { %446 = vrot.lane.b32.xlu0 %v444_v26, %s2490_s27  ;;  %2285 = vmatprep.subr.bf16.mxu0 %v2487_v3 }
 0x32f   :  { %v447_v32 = vpop.permute.xlu0 %446 }
 0x330   :  { %v448_v33 = vsel %vm445_vm5, %v447_v32, %v444_v26 }
 0x331   :  { %449 = vrot.lane.b32.xlu0 %v448_v33, %s2490_s27 }
 0x3a3   :  { %v450_v34 = vpop.permute.xlu0 %449 }
 0x3a4   :  { %v2740_v35 = vsel %vm445_vm5, %v450_v34, %v444_v26  ;;  %v1753_v26 = vld [vmem:[%s3194_s2 + $0x2] sm:$0x1] }
 0x3a5   :  { %466 = vrot.lane.b32.xlu1 %v2740_v35, %s2491_s19  ;;  %v849_v27 = vmul.f32 1.442695, %v1753_v26  ;;  %v1785_v26 = vld [vmem:[%s3201_s9 + $0x90] sm:$0xff] }
 0x3a7   :  { %2423 = vpow2.f32 %v849_v27  ;;  %v1786_v27 = vld [vmem:[%s3201_s9 + $0x98] sm:$0xff] }
 0x3b1   :  { %v2424_v29 = vpop.eup %2423 }
 0x3b2   :  { %v855_v37 = vrot.slane %v2424_v29, %v2596_v14  ;;  %v1787_v29 = vld [vmem:[%s3201_s9 + $0xa0] sm:$0xff] }
 0x417   :  { %v467_v41 = vpop.permute.xlu1 %466 }
 0x418   :  { %2042 = vmatmul.mubr.msk.f32.vlgmr.msra.gmra.mrb[2].mxu0 %vm73_vm1, %v467_v41  ;;  %v1755_v41 = vld [vmem:[%s3195_s3 + $0x48] sm:$0xff] }
 0x419   :  { %2287 = vmatpush3.bf16.msra.mxu0 %v2286_v38  ;;  %2060 = vmatprep.mubr.msk.f32.mxu0 %vm2488_vm0, %v2489_v6  ;;  %v2322_v43 = vpack.c.bf16 %v1755_v41, %v1754_v40  ;;  %v1770_v40 = vld [vmem:[%s3198_s6 + $0x2] ss:$0 sm:$0xff] }
 0x41a   :  { %2288 = vmatprep.subr.bf16.mxu0 %v2487_v3 }
 0x41d   :  { %2290 = vmatpush3.bf16.msra.mxu0 %v2289_v42  ;;  %v1756_v42 = vld [vmem:[%s3195_s3 + $0x50] sm:$0xff] }
 0x41e   :  { %2291 = vmatprep.subr.bf16.mxu0 %v2487_v3 }
 0x421   :  { %2293 = vmatpush3.bf16.msra.mxu0 %v2292_v45  ;;  %v2325_v45 = vpack.c.bf16 %v1757_v44, %v1756_v42 }
 0x422   :  { %2294 = vmatprep.subr.bf16.mxu0 %v2487_v3 }
 0x425   :  { %2296 = vmatpush3.bf16.msra.mxu0 %v2295_v48 }
 0x426   :  { %2309 = vmatprep.subr.bf16.mxu0 %v2487_v3 }
 0x4eb   :  { %v536_v59 = vpop.f32.mrb[2].mxu0 }
 0x4ec   :  { %v537_v62 = vadd.f32 %v1716_v58, %v536_v59  ;;  %v2043_v63 = vpop.f32.mrb[3].mxu0  ;;  %v1763_v58 = vld [vmem:[%s3197_s5 + $0x90] sm:$0xff]  ;;  %v1764_v59 = vld [vmem:[%s3197_s5 + $0x98] sm:$0xff] }
 0x4ed   :  { %v2331_v61 = vpack.c.bf16 %v1764_v59, %v1763_v58  ;;  %v1766_v63 = vld [vmem:[%s3197_s5 + $0xa8] sm:$0xff] }
 0x4ee   :  { %vm540_vm6 = vcmp.ge.f32.partialorder %v537_v62, 0.0  ;;  %v541_v0 = vmul.f32 0.01, %v537_v62 }
 0x4f0   :  { %v542_v5 = vsel %vm540_vm6, %v537_v62, %v541_v0  ;;  %v1765_v62 = vld [vmem:[%s3197_s5 + $0xa0] sm:$0xff] }
 0x4f1   :  { %2061 = vmatmul.mubr.msk.f32.vlgmr.msra.gmra.mrb[4].mxu0 %vm165_vm3, %v542_v5  ;;  %v2334_v0 = vpack.c.bf16 %v1766_v63, %v1765_v62  ;;  %v1772_v5 = vld [vmem:[%s3199_s7 + $0x80] sm:$0xff] }
 0x4f2   :  { %2311 = vmatpush3.bf16.msra.mxu0 %v2310_v1  ;;  %2098 = vmatprep.mubr.msk.f32.mxu0 %vm2488_vm0, %v2489_v6  ;;  %v1767_v1 = vld [vmem:[%s3197_s5 + $0xb0] sm:$0xff]  ;;  %v1795_v62 = vld [vmem:[%s3193_s1 + $0x3] ss:$0 sm:$0xff] }
 0x4f3   :  { %2312 = vmatprep.subr.bf16.mxu0 %v2487_v3  ;;  %v2337_v4 = vpack.c.bf16 %v1768_v2, %v1767_v1 }
 0x4f6   :  { %2314 = vmatpush3.bf16.msra.mxu0 %v2313_v7  ;;  %v1773_v7 = vld [vmem:[%s3199_s7 + $0x88] sm:$0xff] }
 0x4f7   :  { %2315 = vmatprep.subr.bf16.mxu0 %v2487_v3  ;;  %v2340_v8 = vpack.c.bf16 %v1773_v7, %v1772_v5 }
 0x4fa   :  { %2317 = vmatpush3.bf16.msra.mxu0 %v2316_v10  ;;  %v1775_v10 = vld [vmem:[%s3199_s7 + $0x98] sm:$0xff] }
 0x4fb   :  { %2318 = vmatprep.subr.bf16.mxu0 %v2487_v3  ;;  %v2343_v11 = vpack.c.bf16 %v1775_v10, %v1774_v9  ;;  %v1797_v9 = vld [vmem:[%s3195_s3 + $0x60] sm:$0xff]  ;;  %v1799_v10 = vld [vmem:[%s3195_s3 + $0x70] sm:$0xff] }
 0x4fc   :  { %v2367_v15 = vpack.c.bf16 %v1800_v12, %v1799_v10 }
 0x4fe   :  { %2320 = vmatpush3.bf16.msra.mxu0 %v2319_v18 }
 0x4ff   :  { %2339 = vmatprep.subr.bf16.mxu0 %v2487_v3 }
 0x5c4   :  { %v629_v20 = vpop.f32.mrb[4].mxu0 }
 0x5c5   :  { %v630_v22 = vadd.f32 %v1727_v19, %v629_v20  ;;  %v2062_v23 = vpop.f32.mrb[5].mxu0  ;;  %v1783_v19 = vld [vmem:[%s3201_s9 + $0x80] sm:$0xff]  ;;  %v1784_v20 = vld [vmem:[%s3201_s9 + $0x88] sm:$0xff] }
 0x5c7   :  { %vm633_vm7 = vcmp.ge.f32.partialorder %v630_v22, 0.0  ;;  %v634_v24 = vmul.f32 0.01, %v630_v22 }
 0x5c9   :  { %v635_v25 = vsel %vm633_vm7, %v630_v22, %v634_v24 }
 0x5ca   :  { %2080 = vmatmul.mubr.msk.f32.vlgmr.msra.gmra.mrb[6].mxu1 %vm165_vm3, %v635_v25  ;;  %2099 = vmatmul.mubr.msk.f32.vlgmr.msra.gmra.mrb[6].mxu0 %vm165_vm3, %v635_v25  ;;  %v2352_v25 = vpack.c.bf16 %v1784_v20, %v1783_v19  ;;  %v1804_v20 = vld [vmem:[%s3197_s5 + $0xc0] sm:$0xff] }
 0x5cb   :  { %2109 = vmatprep.mubr.msk.f32.mxu1 %vm2488_vm0, %v2489_v6  ;;  %2147 = vmatprep.mubr.msk.f32.mxu0 %vm2488_vm0, %v2489_v6 }
 0x5cc   :  { %2323 = vmatpush3.bf16.msra.mxu1 %v2322_v43  ;;  %2341 = vmatpush3.bf16.msra.mxu0 %v2340_v8 }
 0x5cd   :  { %2324 = vmatprep.subr.bf16.mxu1 %v2487_v3  ;;  %2342 = vmatprep.subr.bf16.mxu0 %v2487_v3 }
 0x5d0   :  { %2326 = vmatpush3.bf16.msra.mxu1 %v2325_v45  ;;  %2344 = vmatpush3.bf16.msra.mxu0 %v2343_v11 }
 0x5d1   :  { %2327 = vmatprep.subr.bf16.mxu1 %v2487_v3  ;;  %2345 = vmatprep.subr.bf16.mxu0 %v2487_v3 }
 0x5d4   :  { %2347 = vmatpush3.bf16.msra.mxu0 %v2346_v16 }
 0x5d5   :  { %2348 = vmatprep.subr.bf16.mxu0 %v2487_v3 }
 0x69d   :  { %v722_v30 = vpop.f32.mrb[6].mxu1  ;;  %v809_v31 = vpop.f32.mrb[6].mxu0 }
 0x69e   :  { %v723_v32 = vadd.f32 %v1738_v21, %v722_v30  ;;  %v810_v33 = vadd.f32 %v1749_v28, %v809_v31  ;;  %v2081_v34 = vpop.f32.mrb[7].mxu1  ;;  %v2100_v36 = vpop.f32.mrb[7].mxu0  ;;  %v2355_v28 = vpack.c.bf16 %v1786_v27, %v1785_v26  ;;  %v1788_v30 = vld [vmem:[%s3201_s9 + $0xa8] sm:$0xff] }
 0x69f   :  { %v2358_v31 = vpack.c.bf16 %v1788_v30, %v1787_v29  ;;  %v1789_v34 = vld [vmem:[%s3201_s9 + $0xb0] sm:$0xff] }
 0x6a0   :  { %2425 = vtanh.f32 %v723_v32  ;;  %822 = vrot.lane.b32.xlu0 %v810_v33, %s2492_s30  ;;  %v1778_v32 = vld [vmem:[%s3199_s7 + $0xb0] sm:$0xff]  ;;  %v1779_v33 = vld [vmem:[%s3199_s7 + $0xb8] sm:$0xff] }
 0x6a1   :  { %v2349_v36 = vpack.c.bf16 %v1779_v33, %v1778_v32  ;;  %v1810_v30 = vld [vmem:[%s3197_s5 + $0xf0] sm:$0xff]  ;;  %v1815_v33 = vld [vmem:[%s3199_s7 + $0xc0] sm:$0xff] }
 0x6a3   :  { %2350 = vmatpush3.bf16.msra.mxu0 %v2349_v36 }
 0x6a4   :  { %856 = vrot.lane.b32.xlu0 %v855_v37, %s2492_s30  ;;  %v1790_v37 = vld [vmem:[%s3201_s9 + $0xb8] sm:$0xff]  ;;  %2363 = vmatprep.subr.bf16.mxu0 %v2487_v3 }
 0x6aa   :  { %v2858_v38 = vpop.eup %2425 }
 0x6ab   :  { %v814_v39 = vmul.f32 1.442695, %v2858_v38 }
 0x6ad   :  { %2427 = vpow2.f32 %v814_v39  ;;  %v2361_v39 = vpack.c.bf16 %v1790_v37, %v1789_v34  ;;  %v1816_v34 = vld [vmem:[%s3199_s7 + $0xc8] sm:$0xff]  ;;  %v1817_v37 = vld [vmem:[%s3199_s7 + $0xd0] sm:$0xff] }
 0x6ae   :  { %v2382_v36 = vpack.c.bf16 %v1816_v34, %v1815_v33 }
 0x6b7   :  { %v2428_v46 = vpop.eup %2427 }
 0x6b8   :  { %817 = vrot.lane.b32.xlu1 %v2428_v46, %s2492_s30  ;;  %v1796_v46 = vld [vmem:[%s3194_s2 + $0x3] sm:$0x1] }
 0x6bc   :  { %843 = vrot.lane.b32.xlu1 %v1752_v47, %s2492_s30  ;;  %v1257_v47 = vmul.f32 1.442695, %v1796_v46  ;;  %v1826_v46 = vld [vmem:[%s3201_s9 + $0xc0] sm:$0xff] }
 0x6be   :  { %2429 = vpow2.f32 %v1257_v47  ;;  %v1827_v47 = vld [vmem:[%s3201_s9 + $0xc8] sm:$0xff] }
 0x712   :  { %v823_v48 = vpop.permute.xlu0 %822 }
 0x716   :  { %v857_v53 = vpop.permute.xlu0 %856 }
 0x72a   :  { %v818_v49 = vpop.permute.xlu1 %817 }
 0x72b   :  { %v820_v50 = vmul.f32 %v818_v49, %v2740_v35  ;;  %v2328_v35 = vpack.c.bf16 %v1762_v57, %v1761_v56  ;;  %v1792_v49 = vld [vmem:[%s3202_s10 + $0x2] ss:$0 sm:$0xff] }
 0x72d   :  { %v2881_v51 = vadd.f32 %v823_v48, %v820_v50  ;;  %v1781_v48 = vld [vmem:[%s3200_s8 + $0x2] ss:$0 sm:$0xff]  ;;  %v2430_v50 = vpop.eup %2429 }
 0x72e   :  { %v844_v52 = vpop.permute.xlu1 %843  ;;  %v1263_v58 = vrot.slane %v2430_v50, %v2596_v14 }
 0x72f   :  { %v846_v54 = vsub.f32 %v2881_v51, %v844_v52 }
 0x731   :  { %v2884_v55 = vmul.f32 %v857_v53, %v846_v54 }
 0x733   :  { %874 = vrot.lane.b32.xlu1 %v2884_v55, %s2491_s19 }
 0x7a5   :  { %v875_v60 = vpop.permute.xlu1 %874 }
 0x7a6   :  { %2110 = vmatmul.mubr.msk.f32.vlgmr.msra.gmra.mrb[8].mxu1 %vm73_vm1, %v875_v60 }
 0x7a7   :  { %2329 = vmatpush3.bf16.msra.mxu1 %v2328_v35  ;;  %2128 = vmatprep.mubr.msk.f32.mxu1 %vm2488_vm0, %v2489_v6 }
 0x7a8   :  { %2330 = vmatprep.subr.bf16.mxu1 %v2487_v3 }
 0x7ab   :  { %2332 = vmatpush3.bf16.msra.mxu1 %v2331_v61 }
 0x7ac   :  { %2333 = vmatprep.subr.bf16.mxu1 %v2487_v3 }
 0x7af   :  { %2335 = vmatpush3.bf16.msra.mxu1 %v2334_v0 }
 0x7b0   :  { %2336 = vmatprep.subr.bf16.mxu1 %v2487_v3 }
 0x7b3   :  { %2338 = vmatpush3.bf16.msra.mxu1 %v2337_v4 }
 0x7b4   :  { %2351 = vmatprep.subr.bf16.mxu1 %v2487_v3 }
 0x879   :  { %v944_v18 = vpop.f32.mrb[8].mxu1 }
 0x87a   :  { %v945_v22 = vadd.f32 %v1759_v17, %v944_v18  ;;  %v2111_v23 = vpop.f32.mrb[9].mxu1 }
 0x87c   :  { %vm948_vm8 = vcmp.ge.f32.partialorder %v945_v22, 0.0  ;;  %v949_v24 = vmul.f32 0.01, %v945_v22 }
 0x87e   :  { %v950_v21 = vsel %vm948_vm8, %v945_v22, %v949_v24  ;;  %v1805_v22 = vld [vmem:[%s3197_s5 + $0xc8] sm:$0xff]  ;;  %v1806_v24 = vld [vmem:[%s3197_s5 + $0xd0] sm:$0xff] }
 0x87f   :  { %2129 = vmatmul.mubr.msk.f32.vlgmr.msra.gmra.mrb[10].mxu1 %vm165_vm3, %v950_v21  ;;  %v2370_v23 = vpack.c.bf16 %v1805_v22, %v1804_v20  ;;  %v1808_v21 = vld [vmem:[%s3197_s5 + $0xe0] sm:$0xff] }
 0x880   :  { %2353 = vmatpush3.bf16.msra.mxu1 %v2352_v25  ;;  %2166 = vmatprep.mubr.msk.f32.mxu1 %vm2488_vm0, %v2489_v6  ;;  %v1807_v25 = vld [vmem:[%s3197_s5 + $0xd8] sm:$0xff] }
 0x881   :  { %2354 = vmatprep.subr.bf16.mxu1 %v2487_v3  ;;  %v2373_v27 = vpack.c.bf16 %v1807_v25, %v1806_v24  ;;  %v420_v24 = vsel %vm73_vm1, %v2710_v13, 0.0 }
 0x884   :  { %2356 = vmatpush3.bf16.msra.mxu1 %v2355_v28  ;;  %v1809_v28 = vld [vmem:[%s3197_s5 + $0xe8] sm:$0xff] }
 0x885   :  { %2357 = vmatprep.subr.bf16.mxu1 %v2487_v3  ;;  %v2376_v29 = vpack.c.bf16 %v1809_v28, %v1808_v21 }
 0x888   :  { %2359 = vmatpush3.bf16.msra.mxu1 %v2358_v31  ;;  %v1811_v31 = vld [vmem:[%s3197_s5 + $0xf8] sm:$0xff] }
 0x889   :  { %2360 = vmatprep.subr.bf16.mxu1 %v2487_v3  ;;  %v2379_v32 = vpack.c.bf16 %v1811_v31, %v1810_v30 }
 0x88c   :  { %2362 = vmatpush3.bf16.msra.mxu1 %v2361_v39  ;;  %v1818_v39 = vld [vmem:[%s3199_s7 + $0xd8] sm:$0xff] }
 0x88d   :  { %2381 = vmatprep.subr.bf16.mxu1 %v2487_v3 }
 0x952   :  { %v1037_v41 = vpop.f32.mrb[10].mxu1 }
 0x953   :  { %v1038_v42 = vadd.f32 %v1770_v40, %v1037_v41  ;;  %v2130_v43 = vpop.f32.mrb[11].mxu1  ;;  %v2385_v40 = vpack.c.bf16 %v1818_v39, %v1817_v37  ;;  %v1819_v41 = vld [vmem:[%s3199_s7 + $0xe0] sm:$0xff] }
 0x955   :  { %vm1041_vm9 = vcmp.ge.f32.partialorder %v1038_v42, 0.0  ;;  %v1042_v44 = vmul.f32 0.01, %v1038_v42 }
 0x957   :  { %v1043_v45 = vsel %vm1041_vm9, %v1038_v42, %v1042_v44  ;;  %v1820_v42 = vld [vmem:[%s3199_s7 + $0xe8] sm:$0xff]  ;;  %v1802_v44 = vld [vmem:[%s3196_s4 + $0x3] ss:$0 sm:$0xff] }
 0x958   :  { %2148 = vmatmul.mubr.msk.f32.vlgmr.msra.gmra.mrb[8].mxu0 %vm165_vm3, %v1043_v45  ;;  %2167 = vmatmul.mubr.msk.f32.vlgmr.msra.gmra.mrb[12].mxu1 %vm165_vm3, %v1043_v45  ;;  %v2388_v43 = vpack.c.bf16 %v1820_v42, %v1819_v41 }
 0x959   :  { %2177 = vmatprep.mubr.msk.f32.mxu0 %vm2488_vm0, %v2489_v6  ;;  %2215 = vmatprep.mubr.msk.f32.mxu1 %vm2488_vm0, %v2489_v6 }
 0x95a   :  { %2383 = vmatpush3.bf16.msra.mxu1 %v2382_v36 }
 0x95b   :  { %2384 = vmatprep.subr.bf16.mxu1 %v2487_v3 }
 0x95e   :  { %2386 = vmatpush3.bf16.msra.mxu1 %v2385_v40 }
 0x95f   :  { %2387 = vmatprep.subr.bf16.mxu1 %v2487_v3 }
 0x962   :  { %2389 = vmatpush3.bf16.msra.mxu1 %v2388_v43 }
 0x963   :  { %2390 = vmatprep.subr.bf16.mxu1 %v2487_v3 }
 0xa2b   :  { %v1130_v52 = vpop.f32.mrb[8].mxu0  ;;  %v1217_v53 = vpop.f32.mrb[12].mxu1 }
 0xa2c   :  { %v1131_v54 = vadd.f32 %v1781_v48, %v1130_v52  ;;  %v1218_v56 = vadd.f32 %v1792_v49, %v1217_v53  ;;  %v2149_v57 = vpop.f32.mrb[9].mxu0  ;;  %v2168_v35 = vpop.f32.mrb[13].mxu1  ;;  %v2394_v52 = vpack.c.bf16 %v1827_v47, %v1826_v46  ;;  %v1828_v53 = vld [vmem:[%s3201_s9 + $0xd0] sm:$0xff] }
 0xa2d   :  { %v1830_v35 = vld [vmem:[%s3201_s9 + $0xe0] sm:$0xff] }
 0xa2e   :  { %2431 = vtanh.f32 %v1131_v54  ;;  %1230 = vrot.lane.b32.xlu1 %v1218_v56, %s2492_s30  ;;  %v1829_v54 = vld [vmem:[%s3201_s9 + $0xd8] sm:$0xff] }
 0xa2f   :  { %v2397_v57 = vpack.c.bf16 %v1829_v54, %v1828_v53 }
 0xa32   :  { %1264 = vrot.lane.b32.xlu1 %v1263_v58, %s2492_s30  ;;  %v1831_v58 = vld [vmem:[%s3201_s9 + $0xe8] sm:$0xff] }
 0xa38   :  { %v3002_v59 = vpop.eup %2431 }
 0xa39   :  { %v1222_v60 = vmul.f32 1.442695, %v3002_v59  ;;  %v1234_v25 = vsel %vm73_vm1, %v3002_v59, 0.0 }
 0xa3b   :  { %2433 = vpow2.f32 %v1222_v60  ;;  %v2400_v60 = vpack.c.bf16 %v1831_v58, %v1830_v35 }
 0xa45   :  { %v2434_v61 = vpop.eup %2433 }
 0xa46   :  { %1225 = vrot.lane.b32.xlu0 %v2434_v61, %s2492_s30  ;;  %v1822_v61 = vld [vmem:[%s3199_s7 + $0xf8] sm:$0xff] }
 0xa4a   :  { %1251 = vrot.lane.b32.xlu0 %v1795_v62, %s2492_s30  ;;  %v1832_v62 = vld [vmem:[%s3201_s9 + $0xf0] sm:$0xff] }
 0xaa0   :  { %v1231_v63 = vpop.permute.xlu1 %1230 }
 0xaa4   :  { %v1265_v4 = vpop.permute.xlu1 %1264 }
 0xab8   :  { %v1226_v0 = vpop.permute.xlu0 %1225 }
 0xab9   :  { %v1228_v14 = vmul.f32 %v1226_v0, %v2884_v55  ;;  %v1798_v55 = vld [vmem:[%s3195_s3 + $0x68] sm:$0xff]  ;;  %v1833_v0 = vld [vmem:[%s3201_s9 + $0xf8] sm:$0xff] }
 0xaba   :  { %v2364_v11 = vpack.c.bf16 %v1798_v55, %v1797_v9  ;;  %v1824_v9 = vld [vmem:[%s3200_s8 + $0x3] ss:$0 sm:$0xff] }
 0xabb   :  { %v3011_v1 = vadd.f32 %v1231_v63, %v1228_v14  ;;  %v2403_v14 = vpack.c.bf16 %v1833_v0, %v1832_v62  ;;  %v1835_v55 = vld [vmem:[%s3202_s10 + $0x3] ss:$0 sm:$0xff]  ;;  %s2493_s10 = smov [#allocation2]  }
 0xabc   :  { %v1252_v2 = vpop.permute.xlu0 %1251  ;;  %2365 = vmatpush3.bf16.msra.mxu0 %v2364_v11 }
 0xabd   :  { %v1254_v5 = vsub.f32 %v3011_v1, %v1252_v2  ;;  %2366 = vmatprep.subr.bf16.mxu0 %v2487_v3 }
 0xabf   :  { %v1267_v7 = vmul.f32 %v1265_v4, %v1254_v5 }
 0xac0   :  { %2368 = vmatpush3.bf16.msra.mxu0 %v2367_v15 }
 0xac1   :  { %1269 = vrot.lane.b32.xlu0 %v1267_v7, %s2491_s19  ;;  %2369 = vmatprep.subr.bf16.mxu0 %v2487_v3 }
 0xb33   :  { %v1270_v8 = vpop.permute.xlu0 %1269 }
 0xb34   :  { %1272 = vrot.lane.b32.xlu1 %v1270_v8, %s2490_s27 }
 0xba6   :  { %v1273_v16 = vpop.permute.xlu1 %1272 }
 0xba7   :  { %v1274_v17 = vsel %vm445_vm5, %v1273_v16, %v1270_v8 }
 0xba8   :  { %1275 = vrot.lane.b32.xlu0 %v1274_v17, %s2490_s27 }
 0xc1a   :  { %v1276_v18 = vpop.permute.xlu0 %1275 }
 0xc1b   :  { %v3033_v19 = vsel %vm445_vm5, %v1276_v18, %v1270_v8 }
 0xc1c   :  { %1292 = vrot.lane.b32.xlu1 %v3033_v19, %s2491_s19 }
 0xc8e   :  { %v1293_v26 = vpop.permute.xlu1 %1292 }
 0xc8f   :  { %2178 = vmatmul.mubr.msk.f32.vlgmr.msra.gmra.mrb[10].mxu0 %vm73_vm1, %v1293_v26 }
 0xc90   :  { %2371 = vmatpush3.bf16.msra.mxu0 %v2370_v23  ;;  %2196 = vmatprep.mubr.msk.f32.mxu0 %vm2488_vm0, %v2489_v6  ;;  %v826_v23 = vsel %vm73_vm1, %v2858_v38, 0.0 }
 0xc91   :  { %2372 = vmatprep.subr.bf16.mxu0 %v2487_v3 }
 0xc94   :  { %2374 = vmatpush3.bf16.msra.mxu0 %v2373_v27 }
 0xc95   :  { %2375 = vmatprep.subr.bf16.mxu0 %v2487_v3 }
 0xc98   :  { %2377 = vmatpush3.bf16.msra.mxu0 %v2376_v29 }
 0xc99   :  { %2378 = vmatprep.subr.bf16.mxu0 %v2487_v3 }
 0xc9c   :  { %2380 = vmatpush3.bf16.msra.mxu0 %v2379_v32 }
 0xc9d   :  { %2393 = vmatprep.subr.bf16.mxu0 %v2487_v3 }
 0xd62   :  { %v1362_v45 = vpop.f32.mrb[10].mxu0 }
 0xd63   :  { %v1363_v48 = vadd.f32 %v1802_v44, %v1362_v45  ;;  %v2179_v49 = vpop.f32.mrb[11].mxu0 }
 0xd65   :  { %vm1366_vm10 = vcmp.ge.f32.partialorder %v1363_v48, 0.0  ;;  %v1367_v50 = vmul.f32 0.01, %v1363_v48 }
 0xd67   :  { %v1368_v56 = vsel %vm1366_vm10, %v1363_v48, %v1367_v50 }
 0xd68   :  { %2197 = vmatmul.mubr.msk.f32.vlgmr.msra.gmra.mrb[12].mxu0 %vm165_vm3, %v1368_v56 }
 0xd69   :  { %2395 = vmatpush3.bf16.msra.mxu0 %v2394_v52  ;;  %2234 = vmatprep.mubr.msk.f32.mxu0 %vm2488_vm0, %v2489_v6  ;;  %v1821_v6 = vld [vmem:[%s3199_s7 + $0xf0] sm:$0xff] }
 0xd6a   :  { %2396 = vmatprep.subr.bf16.mxu0 %v2487_v3  ;;  %v2391_v63 = vpack.c.bf16 %v1822_v61, %v1821_v6 }
 0xd6c   :  { %2392 = vmatpush3.bf16.msra.mxu1 %v2391_v63 }
 0xd6d   :  { %2398 = vmatpush3.bf16.msra.mxu0 %v2397_v57 }
 0xd6e   :  { %2399 = vmatprep.subr.bf16.mxu0 %v2487_v3 }
 0xd71   :  { %2401 = vmatpush3.bf16.msra.mxu0 %v2400_v60 }
 0xd72   :  { %2402 = vmatprep.subr.bf16.mxu0 %v2487_v3  ;;  %v1813_v3 = vld [vmem:[%s3198_s6 + $0x3] ss:$0 sm:$0xff] }
 0xd75   :  { %2404 = vmatpush3.bf16.msra.mxu0 %v2403_v14 }
 0xe3b   :  { %v1455_v2 = vpop.f32.mrb[12].mxu0 }
 0xe3c   :  { %v1456_v4 = vadd.f32 %v1813_v3, %v1455_v2  ;;  %v2198_v5 = vpop.f32.mrb[13].mxu0 }
 0xe3e   :  { %vm1459_vm11 = vcmp.ge.f32.partialorder %v1456_v4, 0.0  ;;  %v1460_v7 = vmul.f32 0.01, %v1456_v4 }
 0xe40   :  { %v1461_v8 = vsel %vm1459_vm11, %v1456_v4, %v1460_v7 }
 0xe41   :  { %2216 = vmatmul.mubr.msk.f32.vlgmr.msra.gmra.mrb[14].mxu1 %vm165_vm3, %v1461_v8  ;;  %2235 = vmatmul.mubr.msk.f32.vlgmr.msra.gmra.mrb[14].mxu0 %vm165_vm3, %v1461_v8 }
 0xf14   :  { %v1548_v10 = vpop.f32.mrb[14].mxu1  ;;  %v1635_v11 = vpop.f32.mrb[14].mxu0 }
 0xf15   :  { %v1549_v12 = vadd.f32 %v1824_v9, %v1548_v10  ;;  %v1636_v15 = vadd.f32 %v1835_v55, %v1635_v11  ;;  %v2217_v16 = vpop.f32.mrb[15].mxu1  ;;  %v2236_v17 = vpop.f32.mrb[15].mxu0 }
 0xf17   :  { %2435 = vtanh.f32 %v1549_v12  ;;  %1648 = vrot.lane.b32.xlu1 %v1636_v15, %s2492_s30 }
 0xf21   :  { %v2436_v18 = vpop.eup %2435 }
 0xf22   :  { %v1640_v20 = vmul.f32 1.442695, %v2436_v18  ;;  %v1652_v26 = vsel %vm73_vm1, %v2436_v18, 0.0 }
 0xf24   :  { %2437 = vpow2.f32 %v1640_v20 }
 0xf2e   :  { %v2438_v22 = vpop.eup %2437 }
 0xf2f   :  { %1643 = vrot.lane.b32.xlu0 %v2438_v22, %s2492_s30  ;;  %s2494_s30 = smov [#allocation4]  }
 0xf30   :  { %s1682_s25 = sshll.u32 %s2494_s30, 4  ;;  %s3159_s25 = int_to_ptr.vmem [resolvable:$true] %s1682_s25 }
 0xf3b   :  { %827 = vadd.xlane.f32.xlu1 %v826_v23 }
 0xf4c   :  { %831 = vrot.lane.b32.xlu1 %v2881_v51, %s2491_s19 }
 0xf4e   :  { %421 = vadd.xlane.f32.xlu0 %v420_v24 }
 0xf52   :  { %1235 = vadd.xlane.f32.xlu0 %v1234_v25 }
 0xf56   :  { %1653 = vadd.xlane.f32.xlu0 %v1652_v26 }
 0xf6c   :  { %1239 = vrot.lane.b32.xlu0 %v3011_v1, %s2491_s19 }
 0xf89   :  { %v1649_v21 = vpop.permute.xlu1 %1648 }
 0xfa1   :  { %v1644_v27 = vpop.permute.xlu0 %1643 }
 0xfa2   :  { %v1646_v38 = vmul.f32 %v1644_v27, %v3033_v19 }
 0xfa4   :  { %v1651_v28 = vadd.f32 %v1649_v21, %v1646_v38 }
 0xfa6   :  { %1657 = vrot.lane.b32.xlu1 %v1651_v28, %s2491_s19  ;;  %s1671_s19 = sshll.u32 %s2493_s10, 4  ;;  %s1672_s19 = int_to_ptr.vmem [resolvable:$true] %s1671_s19 }
 0xfa7   :  { %s2439_s0 = scalar_lea.vmem %s1672_s19, 128  ;;  %p2444_p1 = scmp.lt.s32.totalorder %s1672_s19, %s1672_s19 }
 0xfa8   :  { %p2440_p0 = scmp.ne.s32.totalorder %s1672_s19, %s2439_s0  ;;  %p2445_p2 = scmp.lt.s32.totalorder %s2439_s0, %s2439_s0 }
 0xfaa   :  { %p2446_p3 = por %p2445_p2, %p2444_p1 }
 0xfac   :  { %p2447_p4 = pnand %p2446_p3, %p2440_p0 }
 0xfc8   :  { %v828_v51 = vpop.xlane.xlu1 %827 }
 0xfcc   :  { %v832_v13 = vpop.permute.xlu1 %831 }
 0xfcd   :  { %835 = vst.msk [vmem:[#allocation4 + $0x8] sm:$0xff] %vm73_vm1, %v832_v13 }
 0xfdb   :  { %v422_v29 = vpop.xlane.xlu0 %421 }
 0xfdc   :  { %v829_v30 = vadd.f32 %v828_v51, %v422_v29 }
 0xfdf   :  { %v1236_v59 = vpop.xlane.xlu0 %1235 }
 0xfe0   :  { %v1237_v31 = vadd.f32 %v1236_v59, %v829_v30 }
 0xfe3   :  { %v1654_v32 = vpop.xlane.xlu0 %1653 }
 0xfe4   :  { %v1655_v33 = vadd.f32 %v1654_v32, %v1237_v31 }
 0xfe6   :  { %1664 = vst.msk [vmem:[%s3204_s12] sm:$0xff] %vm1663_vm12, %v1655_v33 }
 0xfe7   :  { %v1240_v1 = vpop.permute.xlu0 %1239 }
 0xfe8   :  { %1243 = vst.msk [vmem:[#allocation4 + $0x10] sm:$0xff] %vm73_vm1, %v1240_v1 }
0x1018   :  { %v1658_v19 = vpop.permute.xlu1 %1657 }
0x1019   :  { %1661 = vst.msk [vmem:[#allocation4 + $0x18] sm:$0xff] %vm73_vm1, %v1658_v19  ;;  %1662 = vst.msk [vmem:[#allocation2] sm:$0xff] %vm73_vm1, %v1658_v19 }
0x101a   :  { %2450 = shalt.err (!%p2447_p4)
}
0x101b   :  { %s2451_s28 = scalar_lea.hbm %s3203_s11, 128 }
0x101c   :  { %p2452_p5 = scmp.ne.s32.totalorder %s3203_s11, %s2451_s28  ;;  %p2455_p6 = scmp.lt.u32.totalorder %s2451_s28, %s3203_s11 }
0x101e   :  { %p2457_p7 = pnand %p2455_p6, %p2452_p5 }
0x1020   :  { %2460 = shalt.err (!%p2457_p7)
}
0x1021   :  { %1674 = dma.vmem_to_hbm [thread:$0]  %s1672_s19, 128, %s3203_s11, [#allocation3]  }
0x1022   :  { %s2461_s17 = scalar_lea.vmem %s3159_s25, 512  ;;  %p2466_p9 = scmp.lt.s32.totalorder %s3159_s25, %s3159_s25 }
0x1023   :  { %p2462_p8 = scmp.ne.s32.totalorder %s3159_s25, %s2461_s17  ;;  %p2467_p10 = scmp.lt.s32.totalorder %s2461_s17, %s2461_s17 }
0x1025   :  { %p2468_p11 = por %p2467_p10, %p2466_p9 }
0x1027   :  { %p2469_p12 = pnand %p2468_p11, %p2462_p8 }
0x1029   :  { %2472 = shalt.err (!%p2469_p12)
}
0x102a   :  { %s2473_s20 = scalar_lea.hbm %s3205_s13, 512 }
0x102b   :  { %p2474_p13 = scmp.ne.s32.totalorder %s3205_s13, %s2473_s20  ;;  %p2477_p0 = scmp.lt.u32.totalorder %s2473_s20, %s3205_s13 }
0x102d   :  { %p2479_p1 = pnand %p2477_p0, %p2474_p13 }
0x102f   :  { %2482 = shalt.err (!%p2479_p1)
}
0x1030   :  { %s2495_s11 = smov 128   ;;  %s2496_s23 = smov 8  }
0x1031   :  { %1688 = dma.vmem_to_hbm [thread:$0]  %s3159_s25, 512, %s3205_s13, [#allocation5], %s2495_s11, %s2495_s11, %s2496_s23  }
0x1032   :  { %2483 = dma.done.wait [#allocation3], 128  }
0x1033   :  { %2484 = vsyncadd [#allocation3], 4294967168 }
0x1034   :  { %2485 = dma.done.wait [#allocation5], 512  }
0x1035   :  { %2486 = vsyncadd [#allocation5], 4294966784 }
0x1036   :  { %1697 = vsyncpa [#allocation3], 1 }
0x1037   :  { %1698 = vsyncpa [#allocation5], 1 }

</bundles_post_ra>
